<compile_context>
chip_gen: v6e
topology: v6e:2x2x1
jax: 0.10.0
libtpu: 0.0.40
codegen_flags: <defaults>
</compile_context>

<pallas_src>
import functools

import jax
import jax.numpy as jnp
from jax import lax
from jax.experimental import pallas as pl
from jax.experimental.pallas import tpu as pltpu


def _round_up(x, m):
    return (x + m - 1) // m * m


def _gru_recurrent_kernel(gi_ref, h0_ref, whh_ref, bhn_ref, out_ref, h_scratch,
                          *, t_block, h_pad, unroll):
    """One grid step == `t_block` GRU time steps for one batch block.

    gi_ref : (t_block, b_block, 3*H_pad) precomputed x@W_ih^T + folded biases,
             gate layout [r | u | n], each H_pad lanes wide.
    h0_ref : (b_block, H_pad)            initial hidden state for this batch block.
    whh_ref: (H_pad, 3*H_pad)            fused, transposed hidden->gates weights.
    bhn_ref: (1, H_pad)                  hidden bias of the "new" gate.
    out_ref: (t_block, b_block, H_pad)   outputs for this (batch, time) block.
    h_scratch: VMEM (b_block, H_pad)     recurrent carry across time-grid steps.
    """
    # Re-initialise the carry at the start of every batch block's time sweep.
    @pl.when(pl.program_id(1) == 0)
    def _():
        h_scratch[...] = h0_ref[...]

    # Hoist loop-invariants OUT of the serial time loop: the weight tile is
    # read from VMEM once per grid step (not once per time step), and the bias
    # broadcast is not re-materialised per iteration (broadcasts aren't CSE'd).
    # TODO(synk): an explicit weight-stationary MXU path
    # (pltpu.matmul_push_rhs / matmul_acc_lhs / matmul_pop) could shave the
    # remaining per-step weight-push latency on v5e/v6e.
    w = whh_ref[...]                                           # (H_pad, 3*H_pad)
    b_hn = jnp.broadcast_to(bhn_ref[...], (out_ref.shape[1], h_pad))

    def step(t, h):
        gi = gi_ref[t]                                         # (b_block, 3*H_pad)
        gh = jnp.dot(h.astype(w.dtype), w,
                     preferred_element_type=jnp.float32)       # (b_block, 3*H_pad)
        r = jax.nn.sigmoid(gi[:, :h_pad] + gh[:, :h_pad])
        u = jax.nn.sigmoid(gi[:, h_pad:2 * h_pad] + gh[:, h_pad:2 * h_pad])
        n = jnp.tanh(gi[:, 2 * h_pad:] + r * (gh[:, 2 * h_pad:] + b_hn))
        hy = n + u * (h - n)          # == u*h + (1-u)*n, one fewer VPU op
        out_ref[t] = hy
        return hy

    h_scratch[...] = lax.fori_loop(0, t_block, step, h_scratch[...],
                                   unroll=unroll)


@functools.partial(jax.jit, static_argnames=("t_block", "use_bf16_matmul"))
def gru_layer_pallas(x, h0, weight_ih, weight_hh, bias_ih, bias_hh,
                     *, t_block=None, use_bf16_matmul=False):
    """GRU over the full sequence; serial recurrence runs in one Pallas kernel.

    x         : (T, B, I)
    h0        : (B, H)
    weight_ih : (3H, I)   (PyTorch layout, gate order r,u,n)
    weight_hh : (3H, H)
    bias_ih   : (3H,)
    bias_hh   : (3H,)
    returns   : outputs (T, B, H), final hidden (B, H)
    """
    T, B, I = x.shape
    H = h0.shape[-1]

    B_pad = _round_up(B, 8)       # f32 sublane tile
    H_pad = _round_up(H, 128)     # lane tile -> lane-dense stores, aligned slices

    # ---- batch blocking: on v7x (2 TCs) shard batch across cores when it is
    # big enough; no effect / no harm on single-TC v5e / v6e.
    if B_pad >= 16 and B_pad % 16 == 0:
        b_block = B_pad // 2
    else:
        b_block = B_pad
    n_b = B_pad // b_block

    # ---- generation-aware VMEM capacity (64 MiB/TC on v7x, 128 MiB v5e/v6e).
    try:
        vmem_cap = int(pltpu.get_tpu_info().vmem_capacity_bytes)
    except Exception:
        vmem_cap = 128 << 20

    f32 = 4
    w_bytes = 2 if use_bf16_matmul else 4
    whh_bytes = H_pad * 3 * H_pad * w_bytes
    # Invariant blocks (whh, h0, b_hn): conservatively counted double-buffered
    # since default pipelining reserves 2 buffers even for constant index maps.
    fixed = (2 * (whh_bytes + b_block * H_pad * f32 + 8 * H_pad * f32)
             + b_block * H_pad * f32)                          # + carry scratch
    per_t = 2 * (b_block * 3 * H_pad + b_block * H_pad) * f32  # gi+out, 2 bufs

    if t_block is None:
        budget = int(0.45 * vmem_cap)
        t_block = 1
        for cand in (128, 64, 32, 16, 8, 4, 2):
            if cand <= max(T, 1) and fixed + cand * per_t <= budget:
                t_block = cand
                break
    T_pad = _round_up(T, t_block)

    # Partial unroll: keep the body visible to the LLO scheduler without
    # blowing up vreg pressure.
    if t_block <= 8:
        unroll = t_block
    elif t_block % 8 == 0:
        unroll = 8
    elif t_block % 4 == 0:
        unroll = 4
    else:
        unroll = 2 if t_block % 2 == 0 else 1

    # ---- Hoisted input projection, produced DIRECTLY in the padded,
    # gate-major layout: pad/reorder the (small) weights & biases once, pad x
    # only along T/B, then one big matmul.  No pad pass over (T, B, 3H).
    wih = weight_ih.reshape(3, H, I).transpose(2, 0, 1)            # (I, 3, H)
    wih = jnp.pad(wih, ((0, 0), (0, 0), (0, H_pad - H))).reshape(I, 3 * H_pad)
    b_fold = bias_ih + jnp.concatenate(
        [bias_hh[:2 * H], jnp.zeros((H,), bias_hh.dtype)])
    b_fold = jnp.pad(b_fold.reshape(3, H),
                     ((0, 0), (0, H_pad - H))).reshape(3 * H_pad)

    x_pad = jnp.pad(x.astype(jnp.float32),
                    ((0, T_pad - T), (0, B_pad - B), (0, 0)))
    if use_bf16_matmul:
        gi = jnp.dot(x_pad.reshape(T_pad * B_pad, I).astype(jnp.bfloat16),
                     wih.astype(jnp.bfloat16),
                     preferred_element_type=jnp.float32)
    else:
        gi = jnp.dot(x_pad.reshape(T_pad * B_pad, I), wih,
                     preferred_element_type=jnp.float32,
                     precision=lax.Precision.HIGHEST)
    gi = (gi + b_fold).reshape(T_pad, B_pad, 3 * H_pad)

    # ---- Fused, transposed, gate-major hidden weights: (H_pad, 3*H_pad).
    whh = weight_hh.reshape(3, H, H).transpose(2, 0, 1)            # (H_in,3,H_out)
    whh = jnp.pad(whh, ((0, H_pad - H), (0, 0), (0, H_pad - H)))
    whh = whh.reshape(H_pad, 3 * H_pad)
    if use_bf16_matmul:
        whh = whh.astype(jnp.bfloat16)     # halves weight VMEM + per-step vld

    b_hn = jnp.pad(bias_hh[2 * H:], ((0, H_pad - H),)).reshape(1, H_pad)
    h0_pad = jnp.pad(h0.astype(jnp.float32),
                     ((0, B_pad - B), (0, H_pad - H)))

    # ---- Explicit VMEM budget, capped at ~78% of physical VMEM.
    needed = fixed + t_block * per_t
    vmem_limit = int(min(max(needed + (4 << 20), 16 << 20),
                         int(0.78 * vmem_cap)))

    kernel = functools.partial(_gru_recurrent_kernel,
                               t_block=t_block, h_pad=H_pad, unroll=unroll)

    grid = (n_b, T_pad // t_block)
    grid_spec = pltpu.PrefetchScalarGridSpec(
        num_scalar_prefetch=0,
        grid=grid,
        in_specs=[
            pl.BlockSpec((t_block, b_block, 3 * H_pad),
                         lambda b, t: (t, b, 0)),                       # gi
            pl.BlockSpec((b_block, H_pad), lambda b, t: (b, 0)),        # h0
            pl.BlockSpec((H_pad, 3 * H_pad), lambda b, t: (0, 0)),      # whh
            pl.BlockSpec((1, H_pad), lambda b, t: (0, 0)),              # b_hn
        ],
        out_specs=pl.BlockSpec((t_block, b_block, H_pad),
                               lambda b, t: (t, b, 0)),
        scratch_shapes=[pltpu.VMEM((b_block, H_pad), jnp.float32)],
    )

    out_pad = pl.pallas_call(
        kernel,
        out_shape=jax.ShapeDtypeStruct((T_pad, B_pad, H_pad), jnp.float32),
        grid_spec=grid_spec,
        compiler_params=pltpu.CompilerParams(
            # batch blocks independent -> parallel (2 TCs on v7x);
            # time recurrence -> strictly sequential.
            dimension_semantics=("parallel", "arbitrary"),
            vmem_limit_bytes=vmem_limit,
        ),
    )(gi, h0_pad, whh, b_hn)

    outputs = out_pad[:T, :B, :H]
    h_final = out_pad[T - 1, :B, :H]
    return outputs, h_final


def rnn_layer_custom_forward(x, state, params):
    """Mirrors RNNLayer_custom.forward (rnn_type='GRU')."""
    dim_flag = state.ndim == 3
    if dim_flag:
        assert state.shape[0] == 1
        state2d = state[0]
    else:
        state2d = state
    outputs, h_final = gru_layer_pallas(
        x, state2d,
        params["weight_ih"], params["weight_hh"],
        params["bias_ih"], params["bias_hh"],
    )
    if dim_flag:
        h_final = h_final[None, ...]
    return outputs, h_final


def _reference_gru(x, h0, weight_ih, weight_hh, bias_ih, bias_hh):
    """Pure-JAX reference replicating the PyTorch GRUCell loop."""
    H = h0.shape[-1]

    def step(h, xt):
        gi = xt @ weight_ih.T + bias_ih
        gh = h @ weight_hh.T + bias_hh
        ri, ui, ni = gi[:, :H], gi[:, H:2 * H], gi[:, 2 * H:]
        rh, uh, nh = gh[:, :H], gh[:, H:2 * H], gh[:, 2 * H:]
        r = jax.nn.sigmoid(ri + rh)
        u = jax.nn.sigmoid(ui + uh)
        n = jnp.tanh(ni + r * nh)
        hy = u * h + (1.0 - u) * n
        return hy, hy

    h_final, ys = jax.lax.scan(step, h0, x)
    return ys, h_final


if __name__ == "__main__":
    seq_len, batch, input_size, hidden = 8, 2, 4, 32

    key = jax.random.PRNGKey(0)
    k_x, k_h, k_wih, k_whh, k_bih, k_bhh = jax.random.split(key, 6)

    x = jax.random.normal(k_x, (seq_len, batch, input_size), dtype=jnp.float32)
    # state in the 3-D "official" format (num_layers=1, batch, hidden)
    state = jax.random.normal(k_h, (1, batch, hidden), dtype=jnp.float32)

    # GRUCell.__init__ uses torch.randn for all params -> standard normal here.
    params = {
        "weight_ih": jax.random.normal(k_wih, (3 * hidden, input_size), jnp.float32),
        "weight_hh": jax.random.normal(k_whh, (3 * hidden, hidden), jnp.float32),
        "bias_ih": jax.random.normal(k_bih, (3 * hidden,), jnp.float32),
        "bias_hh": jax.random.normal(k_bhh, (3 * hidden,), jnp.float32),
    }

    outputs, h_final = rnn_layer_custom_forward(x, state, params)
    outputs = jax.block_until_ready(outputs)
    h_final = jax.block_until_ready(h_final)

    # sanity check against pure-JAX reference
    ref_out, ref_h = _reference_gru(
        x, state[0], params["weight_ih"], params["weight_hh"],
        params["bias_ih"], params["bias_hh"])
    assert outputs.shape == (seq_len, batch, hidden)
    assert h_final.shape == (1, batch, hidden)
    assert jnp.allclose(outputs, ref_out, atol=1e-4, rtol=1e-4)
    assert jnp.allclose(h_final[0], ref_h, atol=1e-4, rtol=1e-4)

    print("KERNEL_OK")
</pallas_src>

<mosaic_0001>
module attributes {stable_mosaic.version = 11 : i64} {
  func.func @_gru_recurrent_kernel(%arg0: i32, %arg1: i32, %arg2: memref<8x8x384xf32, #tpu.memory_space<vmem>>, %arg3: memref<8x128xf32, #tpu.memory_space<vmem>>, %arg4: memref<128x384xf32, #tpu.memory_space<vmem>>, %arg5: memref<1x128xf32, #tpu.memory_space<vmem>>, %arg6: memref<8x8x128xf32, #tpu.memory_space<vmem>>, %arg7: memref<8x128xf32, #tpu.memory_space<vmem>>) attributes {dimension_semantics = [#tpu.dimension_semantics<parallel>, #tpu.dimension_semantics<arbitrary>], iteration_bounds = array<i64: 1, 1>, scalar_prefetch = 0 : i64, scratch_operands = 1 : i64, tpu.core_type = #tpu.core_type<tc>, window_params = [{transform_indices = @transform_0, window_bounds = array<i64: 8, 8, 384>}, {transform_indices = @transform_1, window_bounds = array<i64: 8, 128>}, {pipeline_mode = #tpu.pipeline_mode<synchronous>, transform_indices = @transform_2, window_bounds = array<i64: 128, 384>}, {pipeline_mode = #tpu.pipeline_mode<synchronous>, transform_indices = @transform_3, window_bounds = array<i64: 1, 128>}, {transform_indices = @transform_4, window_bounds = array<i64: 8, 8, 128>}]} {
    %c0_i32 = arith.constant 0 : i32
    %0 = arith.cmpi eq, %arg1, %c0_i32 : i32
    %1 = arith.extui %0 : i1 to i32
    %c0_i32_0 = arith.constant 0 : i32
    %2 = arith.cmpi ne, %1, %c0_i32_0 : i32
    scf.if %2 {
      %c0_64 = arith.constant 0 : index
      %c0_65 = arith.constant 0 : index
      %273 = vector.load %arg3[%c0_64, %c0_65] : memref<8x128xf32, #tpu.memory_space<vmem>>, vector<8x128xf32>
      %c0_66 = arith.constant 0 : index
      %c0_67 = arith.constant 0 : index
      %274 = vector.load %arg7[%c0_66, %c0_67] : memref<8x128xf32, #tpu.memory_space<vmem>>, vector<8x128xf32>
      tpu.vector_store %arg7[%c0_66, %c0_67], %273 {strides = array<i32>} : memref<8x128xf32, #tpu.memory_space<vmem>>, vector<8x128xf32>,
    } else {
    }
    %c0 = arith.constant 0 : index
    %c0_1 = arith.constant 0 : index
    %3 = vector.load %arg4[%c0, %c0_1] : memref<128x384xf32, #tpu.memory_space<vmem>>, vector<128x384xf32>
    %c0_2 = arith.constant 0 : index
    %c0_3 = arith.constant 0 : index
    %4 = vector.load %arg5[%c0_2, %c0_3] : memref<1x128xf32, #tpu.memory_space<vmem>>, vector<1x128xf32>
    %5 = vector.shape_cast %4 : vector<1x128xf32> to vector<1x128xf32>
    %6 = vector.broadcast %5 : vector<1x128xf32> to vector<8x128xf32>
    %c0_4 = arith.constant 0 : index
    %c0_5 = arith.constant 0 : index
    %7 = vector.load %arg7[%c0_4, %c0_5] : memref<8x128xf32, #tpu.memory_space<vmem>>, vector<8x128xf32>
    %c0_i32_6 = arith.constant 0 : i32
    %8 = arith.index_cast %c0_i32_6 : i32 to index
    %c0_7 = arith.constant 0 : index
    %c0_8 = arith.constant 0 : index
    %9 = vector.load %arg2[%8, %c0_7, %c0_8] : memref<8x8x384xf32, #tpu.memory_space<vmem>>, vector<1x8x384xf32>
    %10 = vector.shape_cast %9 : vector<1x8x384xf32> to vector<8x384xf32>
    %cst = arith.constant dense<0.000000e+00> : vector<8x384xf32>
    %11 = tpu.matmul %7, %3, %cst {dimension_numbers = #tpu.dot_dimension_numbers<[1], [0], [0], [1], [0, 0, 1, 1], [], []>} : vector<8x128xf32>, vector<128x384xf32>, vector<8x384xf32> -> vector<8x384xf32>
    %12 = vector.extract_strided_slice %10 {offsets = [0, 0], sizes = [8, 128], strides = [1, 1]} : vector<8x384xf32> to vector<8x128xf32>
    %13 = vector.extract_strided_slice %11 {offsets = [0, 0], sizes = [8, 128], strides = [1, 1]} : vector<8x384xf32> to vector<8x128xf32>
    %14 = arith.addf %12, %13 : vector<8x128xf32>
    %15 = arith.negf %14 : vector<8x128xf32>
    %16 = math.exp %15 : vector<8x128xf32>
    %cst_9 = arith.constant 1.000000e+00 : f32
    %17 = vector.broadcast %cst_9 : f32 to vector<8x128xf32>
    %18 = arith.addf %17, %16 : vector<8x128xf32>
    %19 = arith.divf %17, %18 : vector<8x128xf32>
    %20 = vector.extract_strided_slice %10 {offsets = [0, 128], sizes = [8, 128], strides = [1, 1]} : vector<8x384xf32> to vector<8x128xf32>
    %21 = vector.extract_strided_slice %11 {offsets = [0, 128], sizes = [8, 128], strides = [1, 1]} : vector<8x384xf32> to vector<8x128xf32>
    %22 = arith.addf %20, %21 : vector<8x128xf32>
    %23 = arith.negf %22 : vector<8x128xf32>
    %24 = math.exp %23 : vector<8x128xf32>
    %cst_10 = arith.constant 1.000000e+00 : f32
    %25 = vector.broadcast %cst_10 : f32 to vector<8x128xf32>
    %26 = arith.addf %25, %24 : vector<8x128xf32>
    %27 = arith.divf %25, %26 : vector<8x128xf32>
    %28 = vector.extract_strided_slice %10 {offsets = [0, 256], sizes = [8, 128], strides = [1, 1]} : vector<8x384xf32> to vector<8x128xf32>
    %29 = vector.extract_strided_slice %11 {offsets = [0, 256], sizes = [8, 128], strides = [1, 1]} : vector<8x384xf32> to vector<8x128xf32>
    %30 = arith.addf %29, %6 : vector<8x128xf32>
    %31 = arith.mulf %19, %30 : vector<8x128xf32>
    %32 = arith.addf %28, %31 : vector<8x128xf32>
    %33 = math.tanh %32 : vector<8x128xf32>
    %34 = arith.subf %7, %33 : vector<8x128xf32>
    %35 = arith.mulf %27, %34 : vector<8x128xf32>
    %36 = arith.addf %33, %35 : vector<8x128xf32>
    %37 = arith.index_cast %c0_i32_6 : i32 to index
    %c0_11 = arith.constant 0 : index
    %c0_12 = arith.constant 0 : index
    %38 = vector.load %arg6[%37, %c0_11, %c0_12] : memref<8x8x128xf32, #tpu.memory_space<vmem>>, vector<1x8x128xf32>
    %39 = vector.shape_cast %38 : vector<1x8x128xf32> to vector<8x128xf32>
    %40 = vector.shape_cast %36 : vector<8x128xf32> to vector<1x8x128xf32>
    tpu.vector_store %arg6[%37, %c0_11, %c0_12], %40 {strides = array<i32>} : memref<8x8x128xf32, #tpu.memory_space<vmem>>, vector<1x8x128xf32>,
    %c1_i32 = arith.constant 1 : i32
    %41 = arith.index_cast %c1_i32 : i32 to index
    %c0_13 = arith.constant 0 : index
    %c0_14 = arith.constant 0 : index
    %42 = vector.load %arg2[%41, %c0_13, %c0_14] : memref<8x8x384xf32, #tpu.memory_space<vmem>>, vector<1x8x384xf32>
    %43 = vector.shape_cast %42 : vector<1x8x384xf32> to vector<8x384xf32>
    %cst_15 = arith.constant dense<0.000000e+00> : vector<8x384xf32>
    %44 = tpu.matmul %36, %3, %cst_15 {dimension_numbers = #tpu.dot_dimension_numbers<[1], [0], [0], [1], [0, 0, 1, 1], [], []>} : vector<8x128xf32>, vector<128x384xf32>, vector<8x384xf32> -> vector<8x384xf32>
    %45 = vector.extract_strided_slice %43 {offsets = [0, 0], sizes = [8, 128], strides = [1, 1]} : vector<8x384xf32> to vector<8x128xf32>
    %46 = vector.extract_strided_slice %44 {offsets = [0, 0], sizes = [8, 128], strides = [1, 1]} : vector<8x384xf32> to vector<8x128xf32>
    %47 = arith.addf %45, %46 : vector<8x128xf32>
    %48 = arith.negf %47 : vector<8x128xf32>
    %49 = math.exp %48 : vector<8x128xf32>
    %cst_16 = arith.constant 1.000000e+00 : f32
    %50 = vector.broadcast %cst_16 : f32 to vector<8x128xf32>
    %51 = arith.addf %50, %49 : vector<8x128xf32>
    %52 = arith.divf %50, %51 : vector<8x128xf32>
    %53 = vector.extract_strided_slice %43 {offsets = [0, 128], sizes = [8, 128], strides = [1, 1]} : vector<8x384xf32> to vector<8x128xf32>
    %54 = vector.extract_strided_slice %44 {offsets = [0, 128], sizes = [8, 128], strides = [1, 1]} : vector<8x384xf32> to vector<8x128xf32>
    %55 = arith.addf %53, %54 : vector<8x128xf32>
    %56 = arith.negf %55 : vector<8x128xf32>
    %57 = math.exp %56 : vector<8x128xf32>
    %cst_17 = arith.constant 1.000000e+00 : f32
    %58 = vector.broadcast %cst_17 : f32 to vector<8x128xf32>
    %59 = arith.addf %58, %57 : vector<8x128xf32>
    %60 = arith.divf %58, %59 : vector<8x128xf32>
    %61 = vector.extract_strided_slice %43 {offsets = [0, 256], sizes = [8, 128], strides = [1, 1]} : vector<8x384xf32> to vector<8x128xf32>
    %62 = vector.extract_strided_slice %44 {offsets = [0, 256], sizes = [8, 128], strides = [1, 1]} : vector<8x384xf32> to vector<8x128xf32>
    %63 = arith.addf %62, %6 : vector<8x128xf32>
    %64 = arith.mulf %52, %63 : vector<8x128xf32>
    %65 = arith.addf %61, %64 : vector<8x128xf32>
    %66 = math.tanh %65 : vector<8x128xf32>
    %67 = arith.subf %36, %66 : vector<8x128xf32>
    %68 = arith.mulf %60, %67 : vector<8x128xf32>
    %69 = arith.addf %66, %68 : vector<8x128xf32>
    %70 = arith.index_cast %c1_i32 : i32 to index
    %c0_18 = arith.constant 0 : index
    %c0_19 = arith.constant 0 : index
    %71 = vector.load %arg6[%70, %c0_18, %c0_19] : memref<8x8x128xf32, #tpu.memory_space<vmem>>, vector<1x8x128xf32>
    %72 = vector.shape_cast %71 : vector<1x8x128xf32> to vector<8x128xf32>
    %73 = vector.shape_cast %69 : vector<8x128xf32> to vector<1x8x128xf32>
    tpu.vector_store %arg6[%70, %c0_18, %c0_19], %73 {strides = array<i32>} : memref<8x8x128xf32, #tpu.memory_space<vmem>>, vector<1x8x128xf32>,
    %c2_i32 = arith.constant 2 : i32
    %74 = arith.index_cast %c2_i32 : i32 to index
    %c0_20 = arith.constant 0 : index
    %c0_21 = arith.constant 0 : index
    %75 = vector.load %arg2[%74, %c0_20, %c0_21] : memref<8x8x384xf32, #tpu.memory_space<vmem>>, vector<1x8x384xf32>
    %76 = vector.shape_cast %75 : vector<1x8x384xf32> to vector<8x384xf32>
    %cst_22 = arith.constant dense<0.000000e+00> : vector<8x384xf32>
    %77 = tpu.matmul %69, %3, %cst_22 {dimension_numbers = #tpu.dot_dimension_numbers<[1], [0], [0], [1], [0, 0, 1, 1], [], []>} : vector<8x128xf32>, vector<128x384xf32>, vector<8x384xf32> -> vector<8x384xf32>
    %78 = vector.extract_strided_slice %76 {offsets = [0, 0], sizes = [8, 128], strides = [1, 1]} : vector<8x384xf32> to vector<8x128xf32>
    %79 = vector.extract_strided_slice %77 {offsets = [0, 0], sizes = [8, 128], strides = [1, 1]} : vector<8x384xf32> to vector<8x128xf32>
    %80 = arith.addf %78, %79 : vector<8x128xf32>
    %81 = arith.negf %80 : vector<8x128xf32>
    %82 = math.exp %81 : vector<8x128xf32>
    %cst_23 = arith.constant 1.000000e+00 : f32
    %83 = vector.broadcast %cst_23 : f32 to vector<8x128xf32>
    %84 = arith.addf %83, %82 : vector<8x128xf32>
    %85 = arith.divf %83, %84 : vector<8x128xf32>
    %86 = vector.extract_strided_slice %76 {offsets = [0, 128], sizes = [8, 128], strides = [1, 1]} : vector<8x384xf32> to vector<8x128xf32>
    %87 = vector.extract_strided_slice %77 {offsets = [0, 128], sizes = [8, 128], strides = [1, 1]} : vector<8x384xf32> to vector<8x128xf32>
    %88 = arith.addf %86, %87 : vector<8x128xf32>
    %89 = arith.negf %88 : vector<8x128xf32>
    %90 = math.exp %89 : vector<8x128xf32>
    %cst_24 = arith.constant 1.000000e+00 : f32
    %91 = vector.broadcast %cst_24 : f32 to vector<8x128xf32>
    %92 = arith.addf %91, %90 : vector<8x128xf32>
    %93 = arith.divf %91, %92 : vector<8x128xf32>
    %94 = vector.extract_strided_slice %76 {offsets = [0, 256], sizes = [8, 128], strides = [1, 1]} : vector<8x384xf32> to vector<8x128xf32>
    %95 = vector.extract_strided_slice %77 {offsets = [0, 256], sizes = [8, 128], strides = [1, 1]} : vector<8x384xf32> to vector<8x128xf32>
    %96 = arith.addf %95, %6 : vector<8x128xf32>
    %97 = arith.mulf %85, %96 : vector<8x128xf32>
    %98 = arith.addf %94, %97 : vector<8x128xf32>
    %99 = math.tanh %98 : vector<8x128xf32>
    %100 = arith.subf %69, %99 : vector<8x128xf32>
    %101 = arith.mulf %93, %100 : vector<8x128xf32>
    %102 = arith.addf %99, %101 : vector<8x128xf32>
    %103 = arith.index_cast %c2_i32 : i32 to index
    %c0_25 = arith.constant 0 : index
    %c0_26 = arith.constant 0 : index
    %104 = vector.load %arg6[%103, %c0_25, %c0_26] : memref<8x8x128xf32, #tpu.memory_space<vmem>>, vector<1x8x128xf32>
    %105 = vector.shape_cast %104 : vector<1x8x128xf32> to vector<8x128xf32>
    %106 = vector.shape_cast %102 : vector<8x128xf32> to vector<1x8x128xf32>
    tpu.vector_store %arg6[%103, %c0_25, %c0_26], %106 {strides = array<i32>} : memref<8x8x128xf32, #tpu.memory_space<vmem>>, vector<1x8x128xf32>,
    %c3_i32 = arith.constant 3 : i32
    %107 = arith.index_cast %c3_i32 : i32 to index
    %c0_27 = arith.constant 0 : index
    %c0_28 = arith.constant 0 : index
    %108 = vector.load %arg2[%107, %c0_27, %c0_28] : memref<8x8x384xf32, #tpu.memory_space<vmem>>, vector<1x8x384xf32>
    %109 = vector.shape_cast %108 : vector<1x8x384xf32> to vector<8x384xf32>
    %cst_29 = arith.constant dense<0.000000e+00> : vector<8x384xf32>
    %110 = tpu.matmul %102, %3, %cst_29 {dimension_numbers = #tpu.dot_dimension_numbers<[1], [0], [0], [1], [0, 0, 1, 1], [], []>} : vector<8x128xf32>, vector<128x384xf32>, vector<8x384xf32> -> vector<8x384xf32>
    %111 = vector.extract_strided_slice %109 {offsets = [0, 0], sizes = [8, 128], strides = [1, 1]} : vector<8x384xf32> to vector<8x128xf32>
    %112 = vector.extract_strided_slice %110 {offsets = [0, 0], sizes = [8, 128], strides = [1, 1]} : vector<8x384xf32> to vector<8x128xf32>
    %113 = arith.addf %111, %112 : vector<8x128xf32>
    %114 = arith.negf %113 : vector<8x128xf32>
    %115 = math.exp %114 : vector<8x128xf32>
    %cst_30 = arith.constant 1.000000e+00 : f32
    %116 = vector.broadcast %cst_30 : f32 to vector<8x128xf32>
    %117 = arith.addf %116, %115 : vector<8x128xf32>
    %118 = arith.divf %116, %117 : vector<8x128xf32>
    %119 = vector.extract_strided_slice %109 {offsets = [0, 128], sizes = [8, 128], strides = [1, 1]} : vector<8x384xf32> to vector<8x128xf32>
    %120 = vector.extract_strided_slice %110 {offsets = [0, 128], sizes = [8, 128], strides = [1, 1]} : vector<8x384xf32> to vector<8x128xf32>
    %121 = arith.addf %119, %120 : vector<8x128xf32>
    %122 = arith.negf %121 : vector<8x128xf32>
    %123 = math.exp %122 : vector<8x128xf32>
    %cst_31 = arith.constant 1.000000e+00 : f32
    %124 = vector.broadcast %cst_31 : f32 to vector<8x128xf32>
    %125 = arith.addf %124, %123 : vector<8x128xf32>
    %126 = arith.divf %124, %125 : vector<8x128xf32>
    %127 = vector.extract_strided_slice %109 {offsets = [0, 256], sizes = [8, 128], strides = [1, 1]} : vector<8x384xf32> to vector<8x128xf32>
    %128 = vector.extract_strided_slice %110 {offsets = [0, 256], sizes = [8, 128], strides = [1, 1]} : vector<8x384xf32> to vector<8x128xf32>
    %129 = arith.addf %128, %6 : vector<8x128xf32>
    %130 = arith.mulf %118, %129 : vector<8x128xf32>
    %131 = arith.addf %127, %130 : vector<8x128xf32>
    %132 = math.tanh %131 : vector<8x128xf32>
    %133 = arith.subf %102, %132 : vector<8x128xf32>
    %134 = arith.mulf %126, %133 : vector<8x128xf32>
    %135 = arith.addf %132, %134 : vector<8x128xf32>
    %136 = arith.index_cast %c3_i32 : i32 to index
    %c0_32 = arith.constant 0 : index
    %c0_33 = arith.constant 0 : index
    %137 = vector.load %arg6[%136, %c0_32, %c0_33] : memref<8x8x128xf32, #tpu.memory_space<vmem>>, vector<1x8x128xf32>
    %138 = vector.shape_cast %137 : vector<1x8x128xf32> to vector<8x128xf32>
    %139 = vector.shape_cast %135 : vector<8x128xf32> to vector<1x8x128xf32>
    tpu.vector_store %arg6[%136, %c0_32, %c0_33], %139 {strides = array<i32>} : memref<8x8x128xf32, #tpu.memory_space<vmem>>, vector<1x8x128xf32>,
    %c4_i32 = arith.constant 4 : i32
    %140 = arith.index_cast %c4_i32 : i32 to index
    %c0_34 = arith.constant 0 : index
    %c0_35 = arith.constant 0 : index
    %141 = vector.load %arg2[%140, %c0_34, %c0_35] : memref<8x8x384xf32, #tpu.memory_space<vmem>>, vector<1x8x384xf32>
    %142 = vector.shape_cast %141 : vector<1x8x384xf32> to vector<8x384xf32>
    %cst_36 = arith.constant dense<0.000000e+00> : vector<8x384xf32>
    %143 = tpu.matmul %135, %3, %cst_36 {dimension_numbers = #tpu.dot_dimension_numbers<[1], [0], [0], [1], [0, 0, 1, 1], [], []>} : vector<8x128xf32>, vector<128x384xf32>, vector<8x384xf32> -> vector<8x384xf32>
    %144 = vector.extract_strided_slice %142 {offsets = [0, 0], sizes = [8, 128], strides = [1, 1]} : vector<8x384xf32> to vector<8x128xf32>
    %145 = vector.extract_strided_slice %143 {offsets = [0, 0], sizes = [8, 128], strides = [1, 1]} : vector<8x384xf32> to vector<8x128xf32>
    %146 = arith.addf %144, %145 : vector<8x128xf32>
    %147 = arith.negf %146 : vector<8x128xf32>
    %148 = math.exp %147 : vector<8x128xf32>
    %cst_37 = arith.constant 1.000000e+00 : f32
    %149 = vector.broadcast %cst_37 : f32 to vector<8x128xf32>
    %150 = arith.addf %149, %148 : vector<8x128xf32>
    %151 = arith.divf %149, %150 : vector<8x128xf32>
    %152 = vector.extract_strided_slice %142 {offsets = [0, 128], sizes = [8, 128], strides = [1, 1]} : vector<8x384xf32> to vector<8x128xf32>
    %153 = vector.extract_strided_slice %143 {offsets = [0, 128], sizes = [8, 128], strides = [1, 1]} : vector<8x384xf32> to vector<8x128xf32>
    %154 = arith.addf %152, %153 : vector<8x128xf32>
    %155 = arith.negf %154 : vector<8x128xf32>
    %156 = math.exp %155 : vector<8x128xf32>
    %cst_38 = arith.constant 1.000000e+00 : f32
    %157 = vector.broadcast %cst_38 : f32 to vector<8x128xf32>
    %158 = arith.addf %157, %156 : vector<8x128xf32>
    %159 = arith.divf %157, %158 : vector<8x128xf32>
    %160 = vector.extract_strided_slice %142 {offsets = [0, 256], sizes = [8, 128], strides = [1, 1]} : vector<8x384xf32> to vector<8x128xf32>
    %161 = vector.extract_strided_slice %143 {offsets = [0, 256], sizes = [8, 128], strides = [1, 1]} : vector<8x384xf32> to vector<8x128xf32>
    %162 = arith.addf %161, %6 : vector<8x128xf32>
    %163 = arith.mulf %151, %162 : vector<8x128xf32>
    %164 = arith.addf %160, %163 : vector<8x128xf32>
    %165 = math.tanh %164 : vector<8x128xf32>
    %166 = arith.subf %135, %165 : vector<8x128xf32>
    %167 = arith.mulf %159, %166 : vector<8x128xf32>
    %168 = arith.addf %165, %167 : vector<8x128xf32>
    %169 = arith.index_cast %c4_i32 : i32 to index
    %c0_39 = arith.constant 0 : index
    %c0_40 = arith.constant 0 : index
    %170 = vector.load %arg6[%169, %c0_39, %c0_40] : memref<8x8x128xf32, #tpu.memory_space<vmem>>, vector<1x8x128xf32>
    %171 = vector.shape_cast %170 : vector<1x8x128xf32> to vector<8x128xf32>
    %172 = vector.shape_cast %168 : vector<8x128xf32> to vector<1x8x128xf32>
    tpu.vector_store %arg6[%169, %c0_39, %c0_40], %172 {strides = array<i32>} : memref<8x8x128xf32, #tpu.memory_space<vmem>>, vector<1x8x128xf32>,
    %c5_i32 = arith.constant 5 : i32
    %173 = arith.index_cast %c5_i32 : i32 to index
    %c0_41 = arith.constant 0 : index
    %c0_42 = arith.constant 0 : index
    %174 = vector.load %arg2[%173, %c0_41, %c0_42] : memref<8x8x384xf32, #tpu.memory_space<vmem>>, vector<1x8x384xf32>
    %175 = vector.shape_cast %174 : vector<1x8x384xf32> to vector<8x384xf32>
    %cst_43 = arith.constant dense<0.000000e+00> : vector<8x384xf32>
    %176 = tpu.matmul %168, %3, %cst_43 {dimension_numbers = #tpu.dot_dimension_numbers<[1], [0], [0], [1], [0, 0, 1, 1], [], []>} : vector<8x128xf32>, vector<128x384xf32>, vector<8x384xf32> -> vector<8x384xf32>
    %177 = vector.extract_strided_slice %175 {offsets = [0, 0], sizes = [8, 128], strides = [1, 1]} : vector<8x384xf32> to vector<8x128xf32>
    %178 = vector.extract_strided_slice %176 {offsets = [0, 0], sizes = [8, 128], strides = [1, 1]} : vector<8x384xf32> to vector<8x128xf32>
    %179 = arith.addf %177, %178 : vector<8x128xf32>
    %180 = arith.negf %179 : vector<8x128xf32>
    %181 = math.exp %180 : vector<8x128xf32>
    %cst_44 = arith.constant 1.000000e+00 : f32
    %182 = vector.broadcast %cst_44 : f32 to vector<8x128xf32>
    %183 = arith.addf %182, %181 : vector<8x128xf32>
    %184 = arith.divf %182, %183 : vector<8x128xf32>
    %185 = vector.extract_strided_slice %175 {offsets = [0, 128], sizes = [8, 128], strides = [1, 1]} : vector<8x384xf32> to vector<8x128xf32>
    %186 = vector.extract_strided_slice %176 {offsets = [0, 128], sizes = [8, 128], strides = [1, 1]} : vector<8x384xf32> to vector<8x128xf32>
    %187 = arith.addf %185, %186 : vector<8x128xf32>
    %188 = arith.negf %187 : vector<8x128xf32>
    %189 = math.exp %188 : vector<8x128xf32>
    %cst_45 = arith.constant 1.000000e+00 : f32
    %190 = vector.broadcast %cst_45 : f32 to vector<8x128xf32>
    %191 = arith.addf %190, %189 : vector<8x128xf32>
    %192 = arith.divf %190, %191 : vector<8x128xf32>
    %193 = vector.extract_strided_slice %175 {offsets = [0, 256], sizes = [8, 128], strides = [1, 1]} : vector<8x384xf32> to vector<8x128xf32>
    %194 = vector.extract_strided_slice %176 {offsets = [0, 256], sizes = [8, 128], strides = [1, 1]} : vector<8x384xf32> to vector<8x128xf32>
    %195 = arith.addf %194, %6 : vector<8x128xf32>
    %196 = arith.mulf %184, %195 : vector<8x128xf32>
    %197 = arith.addf %193, %196 : vector<8x128xf32>
    %198 = math.tanh %197 : vector<8x128xf32>
    %199 = arith.subf %168, %198 : vector<8x128xf32>
    %200 = arith.mulf %192, %199 : vector<8x128xf32>
    %201 = arith.addf %198, %200 : vector<8x128xf32>
    %202 = arith.index_cast %c5_i32 : i32 to index
    %c0_46 = arith.constant 0 : index
    %c0_47 = arith.constant 0 : index
    %203 = vector.load %arg6[%202, %c0_46, %c0_47] : memref<8x8x128xf32, #tpu.memory_space<vmem>>, vector<1x8x128xf32>
    %204 = vector.shape_cast %203 : vector<1x8x128xf32> to vector<8x128xf32>
    %205 = vector.shape_cast %201 : vector<8x128xf32> to vector<1x8x128xf32>
    tpu.vector_store %arg6[%202, %c0_46, %c0_47], %205 {strides = array<i32>} : memref<8x8x128xf32, #tpu.memory_space<vmem>>, vector<1x8x128xf32>,
    %c6_i32 = arith.constant 6 : i32
    %206 = arith.index_cast %c6_i32 : i32 to index
    %c0_48 = arith.constant 0 : index
    %c0_49 = arith.constant 0 : index
    %207 = vector.load %arg2[%206, %c0_48, %c0_49] : memref<8x8x384xf32, #tpu.memory_space<vmem>>, vector<1x8x384xf32>
    %208 = vector.shape_cast %207 : vector<1x8x384xf32> to vector<8x384xf32>
    %cst_50 = arith.constant dense<0.000000e+00> : vector<8x384xf32>
    %209 = tpu.matmul %201, %3, %cst_50 {dimension_numbers = #tpu.dot_dimension_numbers<[1], [0], [0], [1], [0, 0, 1, 1], [], []>} : vector<8x128xf32>, vector<128x384xf32>, vector<8x384xf32> -> vector<8x384xf32>
    %210 = vector.extract_strided_slice %208 {offsets = [0, 0], sizes = [8, 128], strides = [1, 1]} : vector<8x384xf32> to vector<8x128xf32>
    %211 = vector.extract_strided_slice %209 {offsets = [0, 0], sizes = [8, 128], strides = [1, 1]} : vector<8x384xf32> to vector<8x128xf32>
    %212 = arith.addf %210, %211 : vector<8x128xf32>
    %213 = arith.negf %212 : vector<8x128xf32>
    %214 = math.exp %213 : vector<8x128xf32>
    %cst_51 = arith.constant 1.000000e+00 : f32
    %215 = vector.broadcast %cst_51 : f32 to vector<8x128xf32>
    %216 = arith.addf %215, %214 : vector<8x128xf32>
    %217 = arith.divf %215, %216 : vector<8x128xf32>
    %218 = vector.extract_strided_slice %208 {offsets = [0, 128], sizes = [8, 128], strides = [1, 1]} : vector<8x384xf32> to vector<8x128xf32>
    %219 = vector.extract_strided_slice %209 {offsets = [0, 128], sizes = [8, 128], strides = [1, 1]} : vector<8x384xf32> to vector<8x128xf32>
    %220 = arith.addf %218, %219 : vector<8x128xf32>
    %221 = arith.negf %220 : vector<8x128xf32>
    %222 = math.exp %221 : vector<8x128xf32>
    %cst_52 = arith.constant 1.000000e+00 : f32
    %223 = vector.broadcast %cst_52 : f32 to vector<8x128xf32>
    %224 = arith.addf %223, %222 : vector<8x128xf32>
    %225 = arith.divf %223, %224 : vector<8x128xf32>
    %226 = vector.extract_strided_slice %208 {offsets = [0, 256], sizes = [8, 128], strides = [1, 1]} : vector<8x384xf32> to vector<8x128xf32>
    %227 = vector.extract_strided_slice %209 {offsets = [0, 256], sizes = [8, 128], strides = [1, 1]} : vector<8x384xf32> to vector<8x128xf32>
    %228 = arith.addf %227, %6 : vector<8x128xf32>
    %229 = arith.mulf %217, %228 : vector<8x128xf32>
    %230 = arith.addf %226, %229 : vector<8x128xf32>
    %231 = math.tanh %230 : vector<8x128xf32>
    %232 = arith.subf %201, %231 : vector<8x128xf32>
    %233 = arith.mulf %225, %232 : vector<8x128xf32>
    %234 = arith.addf %231, %233 : vector<8x128xf32>
    %235 = arith.index_cast %c6_i32 : i32 to index
    %c0_53 = arith.constant 0 : index
    %c0_54 = arith.constant 0 : index
    %236 = vector.load %arg6[%235, %c0_53, %c0_54] : memref<8x8x128xf32, #tpu.memory_space<vmem>>, vector<1x8x128xf32>
    %237 = vector.shape_cast %236 : vector<1x8x128xf32> to vector<8x128xf32>
    %238 = vector.shape_cast %234 : vector<8x128xf32> to vector<1x8x128xf32>
    tpu.vector_store %arg6[%235, %c0_53, %c0_54], %238 {strides = array<i32>} : memref<8x8x128xf32, #tpu.memory_space<vmem>>, vector<1x8x128xf32>,
    %c7_i32 = arith.constant 7 : i32
    %239 = arith.index_cast %c7_i32 : i32 to index
    %c0_55 = arith.constant 0 : index
    %c0_56 = arith.constant 0 : index
    %240 = vector.load %arg2[%239, %c0_55, %c0_56] : memref<8x8x384xf32, #tpu.memory_space<vmem>>, vector<1x8x384xf32>
    %241 = vector.shape_cast %240 : vector<1x8x384xf32> to vector<8x384xf32>
    %cst_57 = arith.constant dense<0.000000e+00> : vector<8x384xf32>
    %242 = tpu.matmul %234, %3, %cst_57 {dimension_numbers = #tpu.dot_dimension_numbers<[1], [0], [0], [1], [0, 0, 1, 1], [], []>} : vector<8x128xf32>, vector<128x384xf32>, vector<8x384xf32> -> vector<8x384xf32>
    %243 = vector.extract_strided_slice %241 {offsets = [0, 0], sizes = [8, 128], strides = [1, 1]} : vector<8x384xf32> to vector<8x128xf32>
    %244 = vector.extract_strided_slice %242 {offsets = [0, 0], sizes = [8, 128], strides = [1, 1]} : vector<8x384xf32> to vector<8x128xf32>
    %245 = arith.addf %243, %244 : vector<8x128xf32>
    %246 = arith.negf %245 : vector<8x128xf32>
    %247 = math.exp %246 : vector<8x128xf32>
    %cst_58 = arith.constant 1.000000e+00 : f32
    %248 = vector.broadcast %cst_58 : f32 to vector<8x128xf32>
    %249 = arith.addf %248, %247 : vector<8x128xf32>
    %250 = arith.divf %248, %249 : vector<8x128xf32>
    %251 = vector.extract_strided_slice %241 {offsets = [0, 128], sizes = [8, 128], strides = [1, 1]} : vector<8x384xf32> to vector<8x128xf32>
    %252 = vector.extract_strided_slice %242 {offsets = [0, 128], sizes = [8, 128], strides = [1, 1]} : vector<8x384xf32> to vector<8x128xf32>
    %253 = arith.addf %251, %252 : vector<8x128xf32>
    %254 = arith.negf %253 : vector<8x128xf32>
    %255 = math.exp %254 : vector<8x128xf32>
    %cst_59 = arith.constant 1.000000e+00 : f32
    %256 = vector.broadcast %cst_59 : f32 to vector<8x128xf32>
    %257 = arith.addf %256, %255 : vector<8x128xf32>
    %258 = arith.divf %256, %257 : vector<8x128xf32>
    %259 = vector.extract_strided_slice %241 {offsets = [0, 256], sizes = [8, 128], strides = [1, 1]} : vector<8x384xf32> to vector<8x128xf32>
    %260 = vector.extract_strided_slice %242 {offsets = [0, 256], sizes = [8, 128], strides = [1, 1]} : vector<8x384xf32> to vector<8x128xf32>
    %261 = arith.addf %260, %6 : vector<8x128xf32>
    %262 = arith.mulf %250, %261 : vector<8x128xf32>
    %263 = arith.addf %259, %262 : vector<8x128xf32>
    %264 = math.tanh %263 : vector<8x128xf32>
    %265 = arith.subf %234, %264 : vector<8x128xf32>
    %266 = arith.mulf %258, %265 : vector<8x128xf32>
    %267 = arith.addf %264, %266 : vector<8x128xf32>
    %268 = arith.index_cast %c7_i32 : i32 to index
    %c0_60 = arith.constant 0 : index
    %c0_61 = arith.constant 0 : index
    %269 = vector.load %arg6[%268, %c0_60, %c0_61] : memref<8x8x128xf32, #tpu.memory_space<vmem>>, vector<1x8x128xf32>
    %270 = vector.shape_cast %269 : vector<1x8x128xf32> to vector<8x128xf32>
    %271 = vector.shape_cast %267 : vector<8x128xf32> to vector<1x8x128xf32>
    tpu.vector_store %arg6[%268, %c0_60, %c0_61], %271 {strides = array<i32>} : memref<8x8x128xf32, #tpu.memory_space<vmem>>, vector<1x8x128xf32>,
    %c8_i32 = arith.constant 8 : i32
    %c0_62 = arith.constant 0 : index
    %c0_63 = arith.constant 0 : index
    %272 = vector.load %arg7[%c0_62, %c0_63] : memref<8x128xf32, #tpu.memory_space<vmem>>, vector<8x128xf32>
    tpu.vector_store %arg7[%c0_62, %c0_63], %267 {strides = array<i32>} : memref<8x128xf32, #tpu.memory_space<vmem>>, vector<8x128xf32>,
    return
  }
  func.func @transform_0(%arg0: i32, %arg1: i32) -> (i32, i32, i32) {
    %c0_i32 = arith.constant 0 : i32
    %c0_i32_0 = arith.constant 0 : i32
    return %arg1, %arg0, %c0_i32 : i32, i32, i32
  }
  func.func @transform_1(%arg0: i32, %arg1: i32) -> (i32, i32) {
    %c0_i32 = arith.constant 0 : i32
    %c0_i32_0 = arith.constant 0 : i32
    return %arg0, %c0_i32 : i32, i32
  }
  func.func @transform_2(%arg0: i32, %arg1: i32) -> (i32, i32) {
    %c0_i32 = arith.constant 0 : i32
    %c0_i32_0 = arith.constant 0 : i32
    %c0_i32_1 = arith.constant 0 : i32
    return %c0_i32, %c0_i32_0 : i32, i32
  }
  func.func @transform_3(%arg0: i32, %arg1: i32) -> (i32, i32) {
    %c0_i32 = arith.constant 0 : i32
    %c0_i32_0 = arith.constant 0 : i32
    %c0_i32_1 = arith.constant 0 : i32
    return %c0_i32, %c0_i32_0 : i32, i32
  }
  func.func @transform_4(%arg0: i32, %arg1: i32) -> (i32, i32, i32) {
    %c0_i32 = arith.constant 0 : i32
    %c0_i32_0 = arith.constant 0 : i32
    return %arg1, %arg0, %c0_i32 : i32, i32, i32
  }
}

</mosaic_0001>

<bundles_post_ra>
// kernel: gru_layer_pallas.1
= control target key start
LH: loop header
LB: loop body
LE: loop exit
PB: predicated region body
PF: predicated region fallthrough
CT: control target
= control target key end

     0   :  { %v3220_v3 = vmov 0.0   ;;  %vm2019_vm0 = vmmov 0   ;;  %s3215_s2 = inlined_call_operand.vmem [shape: f32[128,384], index: 2, kind: input, shape index: {}]   ;;  %s3216_s1 = inlined_call_operand.vmem [shape: f32[8,128], index: 1, kind: input, shape index: {}]   ;;  %s3217_s0 = inlined_call_operand.vmem [shape: f32[8,8,384], index: 0, kind: input, shape index: {}]   ;;  %s3218_s3 = inlined_call_operand.vmem [shape: f32[1,128], index: 3, kind: input, shape index: {}]   ;;  %s3219_s4 = inlined_call_operand.vmem [shape: f32[8,8,128], index: 4, kind: output, shape index: {}]  }
   0x1   :  { %v2048_v0 = vld [vmem:[%s3215_s2 + $0x170] sm:$0xff]  ;;  %v2053_v1 = vld [vmem:[%s3215_s2 + $0x168] sm:$0xff]  ;;  %v2058_v2 = vld [vmem:[%s3215_s2 + $0x158] sm:$0xff]  ;;  %1607 = vmatprep.subr.mxu1 %v3220_v3  ;;  %146 = vmatprep.mubr.f32.mxu0 %v3220_v3 }
   0x2   :  { %3227 = vst [vmem:[#allocation3_spill] sm:$0xff] %v2048_v0  ;;  %82 = vmatprep.subr.mxu0 %v2048_v0  ;;  %v2066_v4 = vld [vmem:[%s3215_s2 + $0x150] sm:$0xff]  ;;  %1639 = vmatprep.mubr.msk.f32.mxu1 %vm2019_vm0, %v3220_v3  ;;  %v2074_v5 = vld [vmem:[%s3215_s2 + $0x140] sm:$0xff]  ;;  %v2080_v6 = vld [vmem:[%s3215_s2 + $0x138] sm:$0xff] }
   0x3   :  { %83 = vmatpush1.msra.mxu0 %v2053_v1  ;;  %v2086_v7 = vld [vmem:[%s3215_s2 + $0x128] sm:$0xff]  ;;  %v2092_v8 = vld [vmem:[%s3215_s2 + $0x120] sm:$0xff]  ;;  %v2098_v9 = vld [vmem:[%s3215_s2 + $0x110] sm:$0xff] }
   0x4   :  { %84 = vmatprep.subr.mxu0 %v2058_v2  ;;  %v2104_v10 = vld [vmem:[%s3215_s2 + $0x108] sm:$0xff]  ;;  %v2110_v11 = vld [vmem:[%s3215_s2 + $0xf8] sm:$0xff]  ;;  %v2116_v12 = vld [vmem:[%s3215_s2 + $0xf0] sm:$0xff] }
   0x5   :  { %85 = vmatpush1.msra.mxu0 %v2066_v4  ;;  %v2122_v13 = vld [vmem:[%s3215_s2 + $0xe0] sm:$0xff]  ;;  %v2127_v14 = vld [vmem:[%s3215_s2 + $0x178] sm:$0xff]  ;;  %v2145_v17 = vld [vmem:[%s3215_s2 + $0xc8] sm:$0xff] }
   0x6   :  { %86 = vmatprep.subr.mxu0 %v2074_v5  ;;  %v2133_v15 = vld [vmem:[%s3215_s2 + $0xd8] sm:$0xff]  ;;  %1608 = vmatpush3.msra.mxu1 %v2127_v14  ;;  %v2139_v16 = vld [vmem:[%s3215_s2 + $0x160] sm:$0xff]  ;;  %v2151_v18 = vld [vmem:[%s3215_s2 + $0x148] sm:$0xff] }
   0x7   :  { %87 = vmatpush1.msra.mxu0 %v2080_v6  ;;  %1609 = vmatprep.subr.mxu1 %v3220_v3  ;;  %v2157_v19 = vld [vmem:[%s3215_s2 + $0xc0] sm:$0xff]  ;;  %v2164_v20 = vld [vmem:[%s3215_s2 + $0xb0] sm:$0xff]  ;;  %v2176_v22 = vld [vmem:[%s3215_s2 + $0xa8] sm:$0xff] }
   0x8   :  { %88 = vmatprep.subr.mxu0 %v2086_v7  ;;  %1610 = vmatpush3.msra.mxu1 %v2139_v16  ;;  %v2170_v21 = vld [vmem:[%s3215_s2 + $0x130] sm:$0xff]  ;;  %v2183_v23 = vld [vmem:[%s3215_s2 + $0x98] sm:$0xff]  ;;  %v2202_v26 = vld [vmem:[%s3215_s2 + $0x80] sm:$0xff] }
   0x9   :  { %89 = vmatpush1.msra.mxu0 %v2092_v8  ;;  %1611 = vmatprep.subr.mxu1 %v3220_v3  ;;  %v2189_v24 = vld [vmem:[%s3215_s2 + $0x118] sm:$0xff]  ;;  %v2195_v25 = vld [vmem:[%s3215_s2 + $0x90] sm:$0xff]  ;;  %v2208_v27 = vld [vmem:[%s3215_s2 + $0x100] sm:$0xff] }
   0xa   :  { %90 = vmatprep.subr.mxu0 %v2098_v9  ;;  %1612 = vmatpush3.msra.mxu1 %v2151_v18  ;;  %v2214_v28 = vld [vmem:[%s3215_s2 + $0x78] sm:$0xff]  ;;  %v2221_v29 = vld [vmem:[%s3215_s2 + $0x68] sm:$0xff]  ;;  %v2233_v31 = vld [vmem:[%s3215_s2 + $0x60] sm:$0xff] }
   0xb   :  { %91 = vmatpush1.msra.mxu0 %v2104_v10  ;;  %1613 = vmatprep.subr.mxu1 %v3220_v3  ;;  %v2227_v30 = vld [vmem:[%s3215_s2 + $0xe8] sm:$0xff]  ;;  %v2240_v32 = vld [vmem:[%s3215_s2 + $0x50] sm:$0xff]  ;;  %v2259_v35 = vld [vmem:[%s3215_s2 + $0x38] sm:$0xff] }
   0xc   :  { %92 = vmatprep.subr.mxu0 %v2110_v11  ;;  %1614 = vmatpush3.msra.mxu1 %v2170_v21  ;;  %v2246_v33 = vld [vmem:[%s3215_s2 + $0xd0] sm:$0xff]  ;;  %v2252_v34 = vld [vmem:[%s3215_s2 + $0x48] sm:$0xff]  ;;  %v2265_v36 = vld [vmem:[%s3215_s2 + $0xb8] sm:$0xff] }
   0xd   :  { %93 = vmatpush1.msra.mxu0 %v2116_v12  ;;  %1615 = vmatprep.subr.mxu1 %v3220_v3  ;;  %v2271_v37 = vld [vmem:[%s3215_s2 + $0x30] sm:$0xff]  ;;  %v2278_v38 = vld [vmem:[%s3215_s2 + $0x20] sm:$0xff]  ;;  %v2290_v40 = vld [vmem:[%s3215_s2 + $0x18] sm:$0xff] }
   0xe   :  { %94 = vmatprep.subr.mxu0 %v2122_v13  ;;  %1616 = vmatpush3.msra.mxu1 %v2189_v24  ;;  %v2284_v39 = vld [vmem:[%s3215_s2 + $0xa0] sm:$0xff]  ;;  %v2297_v41 = vld [vmem:[%s3215_s2 + $0x8] sm:$0xff]  ;;  %v2322_v45 = vld [vmem:[%s3215_s2 + $0x70] sm:$0xff] }
   0xf   :  { %95 = vmatpush1.msra.mxu0 %v2133_v15  ;;  %1617 = vmatprep.subr.mxu1 %v3220_v3  ;;  %v2303_v42 = vld [vmem:[%s3215_s2 + $0x88] sm:$0xff]  ;;  %v2309_v43 = vld [vmem:[%s3215_s2] sm:$0xff]  ;;  %v2331_v46 = vld [vmem:[%s3215_s2 + $0x58] sm:$0xff] }
  0x10   :  { %96 = vmatprep.subr.mxu0 %v2145_v17  ;;  %1618 = vmatpush3.msra.mxu1 %v2208_v27  ;;  %v2316_v44 = vld [vmem:[%s3216_s1] sm:$0xff]  ;;  %v2348_v48 = vld [vmem:[%s3215_s2 + $0x28] sm:$0xff]  ;;  %v2357_v49 = vld [vmem:[%s3215_s2 + $0x10] sm:$0xff] }
  0x11   :  { %97 = vmatpush1.msra.mxu0 %v2157_v19  ;;  %1619 = vmatprep.subr.mxu1 %v3220_v3  ;;  %v2339_v47 = vld [vmem:[%s3215_s2 + $0x40] sm:$0xff]  ;;  %3228 = vst [vmem:[#allocation4_spill] sm:$0xff] %v2357_v49  ;;  %v80_v54 = vld [vmem:[%s3217_s0 + $0x8] sm:$0xff] }
  0x12   :  { %98 = vmatprep.subr.mxu0 %v2164_v20  ;;  %1620 = vmatpush3.msra.mxu1 %v2227_v30  ;;  %v79_v50 = vld [vmem:[%s3217_s0] sm:$0xff] }
  0x13   :  { %99 = vmatpush1.msra.mxu0 %v2176_v22  ;;  %1621 = vmatprep.subr.mxu1 %v3220_v3  ;;  %v2437_v62 = vld [vmem:[%s3218_s3] ss:$0 sm:$0xff] }
  0x14   :  { %100 = vmatprep.subr.mxu0 %v2183_v23  ;;  %1622 = vmatpush3.msra.mxu1 %v2246_v33 }
  0x15   :  { %101 = vmatpush1.msra.mxu0 %v2195_v25  ;;  %1623 = vmatprep.subr.mxu1 %v3220_v3 }
  0x16   :  { %102 = vmatprep.subr.mxu0 %v2202_v26  ;;  %1624 = vmatpush3.msra.mxu1 %v2265_v36 }
  0x17   :  { %103 = vmatpush1.msra.mxu0 %v2214_v28  ;;  %1625 = vmatprep.subr.mxu1 %v3220_v3 }
  0x18   :  { %104 = vmatprep.subr.mxu0 %v2221_v29  ;;  %1626 = vmatpush3.msra.mxu1 %v2284_v39 }
  0x19   :  { %105 = vmatpush1.msra.mxu0 %v2233_v31  ;;  %1627 = vmatprep.subr.mxu1 %v3220_v3 }
  0x1a   :  { %106 = vmatprep.subr.mxu0 %v2240_v32  ;;  %1628 = vmatpush3.msra.mxu1 %v2303_v42 }
  0x1b   :  { %107 = vmatpush1.msra.mxu0 %v2252_v34  ;;  %1629 = vmatprep.subr.mxu1 %v3220_v3 }
  0x1c   :  { %108 = vmatprep.subr.mxu0 %v2259_v35  ;;  %1630 = vmatpush3.msra.mxu1 %v2322_v45 }
  0x1d   :  { %109 = vmatpush1.msra.mxu0 %v2271_v37  ;;  %1631 = vmatprep.subr.mxu1 %v3220_v3 }
  0x1e   :  { %110 = vmatprep.subr.mxu0 %v2278_v38  ;;  %1632 = vmatpush3.msra.mxu1 %v2331_v46 }
  0x1f   :  { %111 = vmatpush1.msra.mxu0 %v2290_v40  ;;  %1633 = vmatprep.subr.mxu1 %v3220_v3 }
  0x20   :  { %112 = vmatprep.subr.mxu0 %v2297_v41  ;;  %1634 = vmatpush3.msra.mxu1 %v2339_v47 }
  0x21   :  { %113 = vmatpush1.msra.mxu0 %v2309_v43  ;;  %1635 = vmatprep.subr.mxu1 %v3220_v3 }
  0x22   :  { %147 = vmatmul.mubr.f32.vlgmr.msra.gmra.mxu0 %v2316_v44  ;;  %249 = vmatprep.subr.mxu0 %v2048_v0 }
  0x23   :  { %250 = vmatpush1.msra.mxu0 %v2053_v1  ;;  %1636 = vmatpush3.msra.mxu1 %v2348_v48 }
  0x24   :  { %251 = vmatprep.subr.mxu0 %v2058_v2  ;;  %1637 = vmatprep.subr.mxu1 %v3220_v3 }
  0x25   :  { %252 = vmatpush1.msra.mxu0 %v2066_v4  ;;  %1638 = vmatpush3.msra.mxu1 %v2357_v49 }
  0x26   :  { %253 = vmatprep.subr.mxu0 %v2074_v5  ;;  %1640 = vmatmul.mubr.f32.vlgmr.msra.gmra.mxu1 %v2316_v44 }
  0x27   :  { %254 = vmatpush1.msra.mxu0 %v2080_v6  ;;  %1642 = vmatprep.subr.mxu1 %v3220_v3 }
  0x28   :  { %255 = vmatprep.subr.mxu0 %v2086_v7  ;;  %1643 = vmatpush3.msra.mxu1 %v2127_v14 }
  0x29   :  { %256 = vmatpush1.msra.mxu0 %v2092_v8  ;;  %1644 = vmatprep.subr.mxu1 %v3220_v3 }
  0x2a   :  { %257 = vmatprep.subr.mxu0 %v2098_v9  ;;  %1645 = vmatpush3.msra.mxu1 %v2139_v16 }
  0x2b   :  { %258 = vmatpush1.msra.mxu0 %v2104_v10  ;;  %1646 = vmatprep.subr.mxu1 %v3220_v3 }
  0x2c   :  { %259 = vmatprep.subr.mxu0 %v2110_v11  ;;  %1647 = vmatpush3.msra.mxu1 %v2151_v18 }
  0x2d   :  { %260 = vmatpush1.msra.mxu0 %v2116_v12  ;;  %1648 = vmatprep.subr.mxu1 %v3220_v3 }
  0x2e   :  { %261 = vmatprep.subr.mxu0 %v2122_v13  ;;  %1649 = vmatpush3.msra.mxu1 %v2170_v21 }
  0x2f   :  { %262 = vmatpush1.msra.mxu0 %v2133_v15  ;;  %1650 = vmatprep.subr.mxu1 %v3220_v3 }
  0x30   :  { %263 = vmatprep.subr.mxu0 %v2145_v17  ;;  %1651 = vmatpush3.msra.mxu1 %v2189_v24 }
  0x31   :  { %264 = vmatpush1.msra.mxu0 %v2157_v19  ;;  %1652 = vmatprep.subr.mxu1 %v3220_v3 }
  0x32   :  { %265 = vmatprep.subr.mxu0 %v2164_v20  ;;  %1653 = vmatpush3.msra.mxu1 %v2208_v27 }
  0x33   :  { %266 = vmatpush1.msra.mxu0 %v2176_v22  ;;  %1654 = vmatprep.subr.mxu1 %v3220_v3 }
  0x34   :  { %267 = vmatprep.subr.mxu0 %v2183_v23  ;;  %1655 = vmatpush3.msra.mxu1 %v2227_v30 }
  0x35   :  { %268 = vmatpush1.msra.mxu0 %v2195_v25  ;;  %1656 = vmatprep.subr.mxu1 %v3220_v3 }
  0x36   :  { %269 = vmatprep.subr.mxu0 %v2202_v26  ;;  %1657 = vmatpush3.msra.mxu1 %v2246_v33 }
  0x37   :  { %270 = vmatpush1.msra.mxu0 %v2214_v28  ;;  %1658 = vmatprep.subr.mxu1 %v3220_v3 }
  0x38   :  { %271 = vmatprep.subr.mxu0 %v2221_v29  ;;  %1659 = vmatpush3.msra.mxu1 %v2265_v36 }
  0x39   :  { %272 = vmatpush1.msra.mxu0 %v2233_v31  ;;  %1660 = vmatprep.subr.mxu1 %v3220_v3 }
  0x3a   :  { %273 = vmatprep.subr.mxu0 %v2240_v32  ;;  %1661 = vmatpush3.msra.mxu1 %v2284_v39 }
  0x3b   :  { %274 = vmatpush1.msra.mxu0 %v2252_v34  ;;  %1662 = vmatprep.subr.mxu1 %v3220_v3 }
  0x3c   :  { %275 = vmatprep.subr.mxu0 %v2259_v35  ;;  %1663 = vmatpush3.msra.mxu1 %v2303_v42 }
  0x3d   :  { %276 = vmatpush1.msra.mxu0 %v2271_v37  ;;  %1664 = vmatprep.subr.mxu1 %v3220_v3 }
  0x3e   :  { %277 = vmatprep.subr.mxu0 %v2278_v38  ;;  %1665 = vmatpush3.msra.mxu1 %v2322_v45 }
  0x3f   :  { %278 = vmatpush1.msra.mxu0 %v2290_v40  ;;  %1666 = vmatprep.subr.mxu1 %v3220_v3 }
  0x40   :  { %279 = vmatprep.subr.mxu0 %v2297_v41  ;;  %1667 = vmatpush3.msra.mxu1 %v2331_v46 }
  0x41   :  { %280 = vmatpush1.msra.mxu0 %v2309_v43  ;;  %313 = vmatprep.mubr.f32.mxu0 %v3220_v3 }
  0x42   :  { %1668 = vmatprep.subr.mxu1 %v3220_v3  ;;  %1674 = vmatprep.mubr.msk.f32.mxu1 %vm2019_vm0, %v3220_v3 }
  0x43   :  { %1669 = vmatpush3.msra.mxu1 %v2339_v47  ;;  %417 = vmatprep.subr.mxu0 %v2048_v0 }
  0x44   :  { %1670 = vmatprep.subr.mxu1 %v3220_v3 }
  0x45   :  { %1671 = vmatpush3.msra.mxu1 %v2348_v48 }
  0x46   :  { %1672 = vmatprep.subr.mxu1 %v3220_v3 }
  0x47   :  { %1673 = vmatpush3.msra.mxu1 %v2357_v49 }
  0x48   :  { %1677 = vmatprep.subr.mxu1 %v3220_v3 }
  0xe2   :  { %v148_v51 = vpop.f32.mrf.mxu0 }
  0xe3   :  { %v223_v52 = vadd.f32 %v148_v51, %v79_v50 }
  0xe4   :  { %v150_v55 = vpop.f32.mrf.mxu0 }
  0xe5   :  { %v1427_v53 = vmul.f32 -1.442695, %v223_v52  ;;  %v230_v58 = vadd.f32 %v150_v55, %v80_v54  ;;  %v81_v52 = vld [vmem:[%s3217_s0 + $0x10] sm:$0xff] }
  0xe6   :  { %v219_v56 = vpop.f32.mrf.mxu1 }
  0xe7   :  { %1889 = vpow2.f32 %v1427_v53  ;;  %v1428_v59 = vmul.f32 -1.442695, %v230_v58  ;;  %v237_v63 = vadd.f32 %v2437_v62, %v219_v56 }
  0xe8   :  { %v1641_v57 = vpop.f32.mrf.mxu1 }
  0xe9   :  { %1891 = vpow2.f32 %v1428_v59 }
  0xf4   :  { %v1890_v60 = vpop.eup %1889 }
  0xf5   :  { %v227_v61 = vadd.f32 1.0, %v1890_v60 }
  0xf6   :  { %v1892_v50 = vpop.eup %1891 }
  0xf7   :  { %1893 = vrcp.f32 %v227_v61  ;;  %v234_v54 = vadd.f32 1.0, %v1892_v50 }
 0x104   :  { %v1894_v51 = vpop.eup %1893 }
 0x105   :  { %v238_v53 = vmul.f32 %v1894_v51, %v237_v63 }
 0x107   :  { %v239_v55 = vadd.f32 %v238_v53, %v81_v52  ;;  %v1430_v53 = vld [vmem:[%s3217_s0 + $0x20] sm:$0xff] }
 0x109   :  { %1895 = vtanh.f32 %v239_v55 }
 0x10a   :  { %1897 = vrcp.f32 %v234_v54 }
 0x116   :  { %v1896_v57 = vpop.eup %1895 }
 0x117   :  { %v241_v58 = vsub.f32 %v2316_v44, %v1896_v57  ;;  %v1898_v59 = vpop.eup %1897  ;;  %v1429_v44 = vld [vmem:[%s3217_s0 + $0x18] sm:$0xff] }
 0x119   :  { %v242_v60 = vmul.f32 %v1898_v59, %v241_v58 }
 0x11b   :  { %v2444_v61 = vadd.f32 %v1896_v57, %v242_v60 }
 0x11d   :  { %244 = vst [vmem:[%s3219_s4] sm:$0xff] %v2444_v61  ;;  %314 = vmatmul.mubr.f32.vlgmr.msra.gmra.mxu0 %v2444_v61  ;;  %1675 = vmatmul.mubr.f32.vlgmr.msra.gmra.mxu1 %v2444_v61 }
 0x11e   :  { %418 = vmatpush1.msra.mxu0 %v2053_v1  ;;  %1678 = vmatpush3.msra.mxu1 %v2127_v14 }
 0x11f   :  { %419 = vmatprep.subr.mxu0 %v2058_v2  ;;  %1679 = vmatprep.subr.mxu1 %v3220_v3 }
 0x120   :  { %420 = vmatpush1.msra.mxu0 %v2066_v4  ;;  %1680 = vmatpush3.msra.mxu1 %v2139_v16 }
 0x121   :  { %421 = vmatprep.subr.mxu0 %v2074_v5  ;;  %1681 = vmatprep.subr.mxu1 %v3220_v3 }
 0x122   :  { %422 = vmatpush1.msra.mxu0 %v2080_v6  ;;  %1682 = vmatpush3.msra.mxu1 %v2151_v18 }
 0x123   :  { %423 = vmatprep.subr.mxu0 %v2086_v7  ;;  %1683 = vmatprep.subr.mxu1 %v3220_v3 }
 0x124   :  { %424 = vmatpush1.msra.mxu0 %v2092_v8  ;;  %1684 = vmatpush3.msra.mxu1 %v2170_v21 }
 0x125   :  { %425 = vmatprep.subr.mxu0 %v2098_v9  ;;  %1685 = vmatprep.subr.mxu1 %v3220_v3 }
 0x126   :  { %426 = vmatpush1.msra.mxu0 %v2104_v10  ;;  %1686 = vmatpush3.msra.mxu1 %v2189_v24 }
 0x127   :  { %427 = vmatprep.subr.mxu0 %v2110_v11  ;;  %1687 = vmatprep.subr.mxu1 %v3220_v3 }
 0x128   :  { %428 = vmatpush1.msra.mxu0 %v2116_v12  ;;  %1688 = vmatpush3.msra.mxu1 %v2208_v27 }
 0x129   :  { %429 = vmatprep.subr.mxu0 %v2122_v13  ;;  %1689 = vmatprep.subr.mxu1 %v3220_v3 }
 0x12a   :  { %430 = vmatpush1.msra.mxu0 %v2133_v15  ;;  %1690 = vmatpush3.msra.mxu1 %v2227_v30 }
 0x12b   :  { %431 = vmatprep.subr.mxu0 %v2145_v17  ;;  %1691 = vmatprep.subr.mxu1 %v3220_v3 }
 0x12c   :  { %432 = vmatpush1.msra.mxu0 %v2157_v19  ;;  %1692 = vmatpush3.msra.mxu1 %v2246_v33 }
 0x12d   :  { %433 = vmatprep.subr.mxu0 %v2164_v20  ;;  %1693 = vmatprep.subr.mxu1 %v3220_v3 }
 0x12e   :  { %434 = vmatpush1.msra.mxu0 %v2176_v22  ;;  %1694 = vmatpush3.msra.mxu1 %v2265_v36 }
 0x12f   :  { %435 = vmatprep.subr.mxu0 %v2183_v23  ;;  %1695 = vmatprep.subr.mxu1 %v3220_v3 }
 0x130   :  { %436 = vmatpush1.msra.mxu0 %v2195_v25  ;;  %1696 = vmatpush3.msra.mxu1 %v2284_v39 }
 0x131   :  { %437 = vmatprep.subr.mxu0 %v2202_v26  ;;  %1697 = vmatprep.subr.mxu1 %v3220_v3 }
 0x132   :  { %438 = vmatpush1.msra.mxu0 %v2214_v28  ;;  %1698 = vmatpush3.msra.mxu1 %v2303_v42 }
 0x133   :  { %439 = vmatprep.subr.mxu0 %v2221_v29  ;;  %1699 = vmatprep.subr.mxu1 %v3220_v3 }
 0x134   :  { %440 = vmatpush1.msra.mxu0 %v2233_v31  ;;  %1700 = vmatpush3.msra.mxu1 %v2322_v45 }
 0x135   :  { %441 = vmatprep.subr.mxu0 %v2240_v32  ;;  %1701 = vmatprep.subr.mxu1 %v3220_v3 }
 0x136   :  { %442 = vmatpush1.msra.mxu0 %v2252_v34  ;;  %1702 = vmatpush3.msra.mxu1 %v2331_v46 }
 0x137   :  { %443 = vmatprep.subr.mxu0 %v2259_v35  ;;  %1703 = vmatprep.subr.mxu1 %v3220_v3 }
 0x138   :  { %444 = vmatpush1.msra.mxu0 %v2271_v37  ;;  %1704 = vmatpush3.msra.mxu1 %v2339_v47 }
 0x139   :  { %445 = vmatprep.subr.mxu0 %v2278_v38  ;;  %1705 = vmatprep.subr.mxu1 %v3220_v3 }
 0x13a   :  { %446 = vmatpush1.msra.mxu0 %v2290_v40  ;;  %1706 = vmatpush3.msra.mxu1 %v2348_v48 }
 0x13b   :  { %447 = vmatprep.subr.mxu0 %v2297_v41  ;;  %1707 = vmatprep.subr.mxu1 %v3220_v3 }
 0x13c   :  { %448 = vmatpush1.msra.mxu0 %v2309_v43  ;;  %481 = vmatprep.mubr.f32.mxu0 %v3220_v3 }
 0x13d   :  { %1708 = vmatpush3.msra.mxu1 %v2357_v49  ;;  %1709 = vmatprep.mubr.msk.f32.mxu1 %vm2019_vm0, %v3220_v3 }
 0x13e   :  { %585 = vmatprep.subr.mxu0 %v2048_v0  ;;  %1712 = vmatprep.subr.mxu1 %v3220_v3 }
 0x1dd   :  { %v315_v56 = vpop.f32.mrf.mxu0  ;;  %v386_v63 = vpop.f32.mrf.mxu1 }
 0x1de   :  { %v390_v50 = vadd.f32 %v1429_v44, %v315_v56  ;;  %v404_v3 = vadd.f32 %v2437_v62, %v386_v63  ;;  %v1431_v44 = vld [vmem:[%s3217_s0 + $0x28] sm:$0xff] }
 0x1df   :  { %v1676_v51 = vpop.f32.mrf.mxu1  ;;  %v317_v54 = vpop.f32.mrf.mxu0 }
 0x1e0   :  { %v1432_v52 = vmul.f32 -1.442695, %v390_v50  ;;  %v397_v55 = vadd.f32 %v1430_v53, %v317_v54 }
 0x1e2   :  { %1899 = vpow2.f32 %v1432_v52  ;;  %v1433_v57 = vmul.f32 -1.442695, %v397_v55 }
 0x1e4   :  { %1901 = vpow2.f32 %v1433_v57 }
 0x1ef   :  { %v1900_v58 = vpop.eup %1899 }
 0x1f0   :  { %v394_v59 = vadd.f32 1.0, %v1900_v58 }
 0x1f1   :  { %v1902_v60 = vpop.eup %1901 }
 0x1f2   :  { %1903 = vrcp.f32 %v394_v59  ;;  %v401_v51 = vadd.f32 1.0, %v1902_v60 }
 0x1ff   :  { %v1904_v0 = vpop.eup %1903 }
 0x200   :  { %v405_v56 = vmul.f32 %v1904_v0, %v404_v3  ;;  %v3229_v0 = vmov 0.0   ;;  %v3230_v3 = vld [vmem:[#allocation3_spill] sm:$0xff] }
 0x202   :  { %v406_v50 = vadd.f32 %v1431_v44, %v405_v56  ;;  %v1436_v56 = vld [vmem:[%s3217_s0 + $0x38] sm:$0xff] }
 0x204   :  { %1905 = vtanh.f32 %v406_v50 }
 0x205   :  { %1907 = vrcp.f32 %v401_v51 }
 0x211   :  { %v1906_v52 = vpop.eup %1905 }
 0x212   :  { %v408_v53 = vsub.f32 %v2444_v61, %v1906_v52  ;;  %v1908_v54 = vpop.eup %1907  ;;  %v1435_v61 = vld [vmem:[%s3217_s0 + $0x30] sm:$0xff] }
 0x214   :  { %v409_v55 = vmul.f32 %v1908_v54, %v408_v53 }
 0x216   :  { %v2530_v57 = vadd.f32 %v1906_v52, %v409_v55 }
 0x218   :  { %1434 = vst [vmem:[%s3219_s4 + $0x8] sm:$0xff] %v2530_v57  ;;  %482 = vmatmul.mubr.f32.vlgmr.msra.gmra.mxu0 %v2530_v57  ;;  %1710 = vmatmul.mubr.f32.vlgmr.msra.gmra.mxu1 %v2530_v57 }
 0x219   :  { %586 = vmatpush1.msra.mxu0 %v2053_v1  ;;  %1713 = vmatpush3.msra.mxu1 %v2127_v14 }
 0x21a   :  { %587 = vmatprep.subr.mxu0 %v2058_v2  ;;  %1714 = vmatprep.subr.mxu1 %v3229_v0 }
 0x21b   :  { %588 = vmatpush1.msra.mxu0 %v2066_v4  ;;  %1715 = vmatpush3.msra.mxu1 %v2139_v16 }
 0x21c   :  { %589 = vmatprep.subr.mxu0 %v2074_v5  ;;  %1716 = vmatprep.subr.mxu1 %v3229_v0 }
 0x21d   :  { %590 = vmatpush1.msra.mxu0 %v2080_v6  ;;  %1717 = vmatpush3.msra.mxu1 %v2151_v18 }
 0x21e   :  { %591 = vmatprep.subr.mxu0 %v2086_v7  ;;  %1718 = vmatprep.subr.mxu1 %v3229_v0 }
 0x21f   :  { %592 = vmatpush1.msra.mxu0 %v2092_v8  ;;  %1719 = vmatpush3.msra.mxu1 %v2170_v21 }
 0x220   :  { %593 = vmatprep.subr.mxu0 %v2098_v9  ;;  %1720 = vmatprep.subr.mxu1 %v3229_v0 }
 0x221   :  { %594 = vmatpush1.msra.mxu0 %v2104_v10  ;;  %1721 = vmatpush3.msra.mxu1 %v2189_v24 }
 0x222   :  { %595 = vmatprep.subr.mxu0 %v2110_v11  ;;  %1722 = vmatprep.subr.mxu1 %v3229_v0 }
 0x223   :  { %596 = vmatpush1.msra.mxu0 %v2116_v12  ;;  %1723 = vmatpush3.msra.mxu1 %v2208_v27 }
 0x224   :  { %597 = vmatprep.subr.mxu0 %v2122_v13  ;;  %1724 = vmatprep.subr.mxu1 %v3229_v0 }
 0x225   :  { %598 = vmatpush1.msra.mxu0 %v2133_v15  ;;  %1725 = vmatpush3.msra.mxu1 %v2227_v30 }
 0x226   :  { %599 = vmatprep.subr.mxu0 %v2145_v17  ;;  %1726 = vmatprep.subr.mxu1 %v3229_v0 }
 0x227   :  { %600 = vmatpush1.msra.mxu0 %v2157_v19  ;;  %1727 = vmatpush3.msra.mxu1 %v2246_v33 }
 0x228   :  { %601 = vmatprep.subr.mxu0 %v2164_v20  ;;  %1728 = vmatprep.subr.mxu1 %v3229_v0 }
 0x229   :  { %602 = vmatpush1.msra.mxu0 %v2176_v22  ;;  %1729 = vmatpush3.msra.mxu1 %v2265_v36 }
 0x22a   :  { %603 = vmatprep.subr.mxu0 %v2183_v23  ;;  %1730 = vmatprep.subr.mxu1 %v3229_v0 }
 0x22b   :  { %604 = vmatpush1.msra.mxu0 %v2195_v25  ;;  %1731 = vmatpush3.msra.mxu1 %v2284_v39 }
 0x22c   :  { %605 = vmatprep.subr.mxu0 %v2202_v26  ;;  %1732 = vmatprep.subr.mxu1 %v3229_v0 }
 0x22d   :  { %606 = vmatpush1.msra.mxu0 %v2214_v28  ;;  %1733 = vmatpush3.msra.mxu1 %v2303_v42 }
 0x22e   :  { %607 = vmatprep.subr.mxu0 %v2221_v29  ;;  %1734 = vmatprep.subr.mxu1 %v3229_v0 }
 0x22f   :  { %608 = vmatpush1.msra.mxu0 %v2233_v31  ;;  %1735 = vmatpush3.msra.mxu1 %v2322_v45 }
 0x230   :  { %609 = vmatprep.subr.mxu0 %v2240_v32  ;;  %1736 = vmatprep.subr.mxu1 %v3229_v0 }
 0x231   :  { %610 = vmatpush1.msra.mxu0 %v2252_v34  ;;  %1737 = vmatpush3.msra.mxu1 %v2331_v46 }
 0x232   :  { %611 = vmatprep.subr.mxu0 %v2259_v35  ;;  %1738 = vmatprep.subr.mxu1 %v3229_v0 }
 0x233   :  { %612 = vmatpush1.msra.mxu0 %v2271_v37  ;;  %1739 = vmatpush3.msra.mxu1 %v2339_v47 }
 0x234   :  { %613 = vmatprep.subr.mxu0 %v2278_v38  ;;  %1740 = vmatprep.subr.mxu1 %v3229_v0 }
 0x235   :  { %614 = vmatpush1.msra.mxu0 %v2290_v40  ;;  %1741 = vmatpush3.msra.mxu1 %v2348_v48 }
 0x236   :  { %615 = vmatprep.subr.mxu0 %v2297_v41  ;;  %1742 = vmatprep.subr.mxu1 %v3229_v0 }
 0x237   :  { %616 = vmatpush1.msra.mxu0 %v2309_v43  ;;  %649 = vmatprep.mubr.f32.mxu0 %v3229_v0 }
 0x238   :  { %1743 = vmatpush3.msra.mxu1 %v2357_v49  ;;  %1744 = vmatprep.mubr.msk.f32.mxu1 %vm2019_vm0, %v3229_v0 }
 0x239   :  { %753 = vmatprep.subr.mxu0 %v3230_v3  ;;  %1747 = vmatprep.subr.mxu1 %v3229_v0 }
 0x2d8   :  { %v483_v63 = vpop.f32.mrf.mxu0  ;;  %v554_v58 = vpop.f32.mrf.mxu1 }
 0x2d9   :  { %v558_v59 = vadd.f32 %v1435_v61, %v483_v63  ;;  %v572_v3 = vadd.f32 %v2437_v62, %v554_v58  ;;  %v1437_v61 = vld [vmem:[%s3217_s0 + $0x40] sm:$0xff] }
 0x2da   :  { %v1711_v60 = vpop.f32.mrf.mxu1  ;;  %v485_v50 = vpop.f32.mrf.mxu0 }
 0x2db   :  { %v1438_v44 = vmul.f32 -1.442695, %v558_v59  ;;  %v565_v51 = vadd.f32 %v1436_v56, %v485_v50 }
 0x2dd   :  { %1909 = vpow2.f32 %v1438_v44  ;;  %v1439_v52 = vmul.f32 -1.442695, %v565_v51 }
 0x2df   :  { %1911 = vpow2.f32 %v1439_v52 }
 0x2ea   :  { %v1910_v53 = vpop.eup %1909 }
 0x2eb   :  { %v562_v54 = vadd.f32 1.0, %v1910_v53  ;;  %v1443_v53 = vld [vmem:[%s3217_s0 + $0x58] sm:$0xff] }
 0x2ec   :  { %v1912_v55 = vpop.eup %1911 }
 0x2ed   :  { %1913 = vrcp.f32 %v562_v54  ;;  %v569_v60 = vadd.f32 1.0, %v1912_v55 }
 0x2fa   :  { %v1914_v49 = vpop.eup %1913 }
 0x2fb   :  { %v573_v63 = vmul.f32 %v1914_v49, %v572_v3 }
 0x2fd   :  { %v574_v59 = vadd.f32 %v1437_v61, %v573_v63 }
 0x2ff   :  { %1915 = vtanh.f32 %v574_v59 }
 0x300   :  { %1917 = vrcp.f32 %v569_v60 }
 0x30c   :  { %v1916_v44 = vpop.eup %1915 }
 0x30d   :  { %v576_v56 = vsub.f32 %v2530_v57, %v1916_v44  ;;  %v1918_v50 = vpop.eup %1917 }
 0x30f   :  { %v577_v51 = vmul.f32 %v1918_v50, %v576_v56  ;;  %v2713_v50 = vld [vmem:[%s3215_s2 + $0x168] sm:$0xff] }
 0x311   :  { %v2616_v52 = vadd.f32 %v1916_v44, %v577_v51  ;;  %v2720_v51 = vld [vmem:[%s3215_s2 + $0x158] sm:$0xff] }
 0x313   :  { %1440 = vst [vmem:[%s3219_s4 + $0x10] sm:$0xff] %v2616_v52  ;;  %650 = vmatmul.mubr.f32.vlgmr.msra.gmra.mxu0 %v2616_v52  ;;  %1745 = vmatmul.mubr.f32.vlgmr.msra.gmra.mxu1 %v2616_v52 }
 0x314   :  { %754 = vmatpush1.msra.mxu0 %v2053_v1  ;;  %1748 = vmatpush3.msra.mxu1 %v2127_v14  ;;  %v3231_v1 = vld [vmem:[#allocation4_spill] sm:$0xff] }
 0x315   :  { %755 = vmatprep.subr.mxu0 %v2058_v2  ;;  %1749 = vmatprep.subr.mxu1 %v3229_v0  ;;  %v3232_v2 = vld [vmem:[#allocation3_spill] sm:$0xff] }
 0x316   :  { %756 = vmatpush1.msra.mxu0 %v2066_v4  ;;  %1750 = vmatpush3.msra.mxu1 %v2139_v16  ;;  %v1441_v4 = vld [vmem:[%s3217_s0 + $0x48] sm:$0xff] }
 0x317   :  { %757 = vmatprep.subr.mxu0 %v2074_v5  ;;  %1751 = vmatprep.subr.mxu1 %v3229_v0 }
 0x318   :  { %758 = vmatpush1.msra.mxu0 %v2080_v6  ;;  %1752 = vmatpush3.msra.mxu1 %v2151_v18 }
 0x319   :  { %759 = vmatprep.subr.mxu0 %v2086_v7  ;;  %1753 = vmatprep.subr.mxu1 %v3229_v0 }
 0x31a   :  { %760 = vmatpush1.msra.mxu0 %v2092_v8  ;;  %1754 = vmatpush3.msra.mxu1 %v2170_v21 }
 0x31b   :  { %761 = vmatprep.subr.mxu0 %v2098_v9  ;;  %1755 = vmatprep.subr.mxu1 %v3229_v0 }
 0x31c   :  { %762 = vmatpush1.msra.mxu0 %v2104_v10  ;;  %1756 = vmatpush3.msra.mxu1 %v2189_v24  ;;  %v1442_v10 = vld [vmem:[%s3217_s0 + $0x50] sm:$0xff] }
 0x31d   :  { %763 = vmatprep.subr.mxu0 %v2110_v11  ;;  %1757 = vmatprep.subr.mxu1 %v3229_v0 }
 0x31e   :  { %764 = vmatpush1.msra.mxu0 %v2116_v12  ;;  %1758 = vmatpush3.msra.mxu1 %v2208_v27 }
 0x31f   :  { %765 = vmatprep.subr.mxu0 %v2122_v13  ;;  %1759 = vmatprep.subr.mxu1 %v3229_v0 }
 0x320   :  { %766 = vmatpush1.msra.mxu0 %v2133_v15  ;;  %1760 = vmatpush3.msra.mxu1 %v2227_v30 }
 0x321   :  { %767 = vmatprep.subr.mxu0 %v2145_v17  ;;  %1761 = vmatprep.subr.mxu1 %v3229_v0 }
 0x322   :  { %768 = vmatpush1.msra.mxu0 %v2157_v19  ;;  %1762 = vmatpush3.msra.mxu1 %v2246_v33 }
 0x323   :  { %769 = vmatprep.subr.mxu0 %v2164_v20  ;;  %1763 = vmatprep.subr.mxu1 %v3229_v0 }
 0x324   :  { %770 = vmatpush1.msra.mxu0 %v2176_v22  ;;  %1764 = vmatpush3.msra.mxu1 %v2265_v36 }
 0x325   :  { %771 = vmatprep.subr.mxu0 %v2183_v23  ;;  %1765 = vmatprep.subr.mxu1 %v3229_v0 }
 0x326   :  { %772 = vmatpush1.msra.mxu0 %v2195_v25  ;;  %1766 = vmatpush3.msra.mxu1 %v2284_v39 }
 0x327   :  { %773 = vmatprep.subr.mxu0 %v2202_v26  ;;  %1767 = vmatprep.subr.mxu1 %v3229_v0 }
 0x328   :  { %774 = vmatpush1.msra.mxu0 %v2214_v28  ;;  %1768 = vmatpush3.msra.mxu1 %v2303_v42 }
 0x329   :  { %775 = vmatprep.subr.mxu0 %v2221_v29  ;;  %1769 = vmatprep.subr.mxu1 %v3229_v0 }
 0x32a   :  { %776 = vmatpush1.msra.mxu0 %v2233_v31  ;;  %1770 = vmatpush3.msra.mxu1 %v2322_v45 }
 0x32b   :  { %777 = vmatprep.subr.mxu0 %v2240_v32  ;;  %1771 = vmatprep.subr.mxu1 %v3229_v0 }
 0x32c   :  { %778 = vmatpush1.msra.mxu0 %v2252_v34  ;;  %1772 = vmatpush3.msra.mxu1 %v2331_v46 }
 0x32d   :  { %779 = vmatprep.subr.mxu0 %v2259_v35  ;;  %1773 = vmatprep.subr.mxu1 %v3229_v0 }
 0x32e   :  { %780 = vmatpush1.msra.mxu0 %v2271_v37  ;;  %1774 = vmatpush3.msra.mxu1 %v2339_v47 }
 0x32f   :  { %781 = vmatprep.subr.mxu0 %v2278_v38  ;;  %1775 = vmatprep.subr.mxu1 %v3229_v0 }
 0x330   :  { %782 = vmatpush1.msra.mxu0 %v2290_v40  ;;  %1776 = vmatpush3.msra.mxu1 %v2348_v48 }
 0x331   :  { %783 = vmatprep.subr.mxu0 %v2297_v41  ;;  %1777 = vmatprep.subr.mxu1 %v3229_v0 }
 0x332   :  { %784 = vmatpush1.msra.mxu0 %v2309_v43  ;;  %817 = vmatprep.mubr.f32.mxu0 %v3229_v0 }
 0x333   :  { %1778 = vmatpush3.msra.mxu1 %v3231_v1  ;;  %1779 = vmatprep.mubr.msk.f32.mxu1 %vm2019_vm0, %v3229_v0 }
 0x334   :  { %921 = vmatprep.subr.mxu0 %v3232_v2  ;;  %1782 = vmatprep.subr.mxu1 %v3229_v0  ;;  %v2741_v2 = vld [vmem:[%s3215_s2 + $0x138] sm:$0xff] }
 0x3d3   :  { %v651_v5 = vpop.f32.mrf.mxu0  ;;  %v722_v6 = vpop.f32.mrf.mxu1 }
 0x3d4   :  { %v726_v7 = vadd.f32 %v1441_v4, %v651_v5  ;;  %v740_v3 = vadd.f32 %v2437_v62, %v722_v6  ;;  %v2755_v4 = vld [vmem:[%s3215_s2 + $0x120] sm:$0xff]  ;;  %v2769_v5 = vld [vmem:[%s3215_s2 + $0x108] sm:$0xff]  ;;  %v2783_v6 = vld [vmem:[%s3215_s2 + $0xf0] sm:$0xff] }
 0x3d5   :  { %v1746_v8 = vpop.f32.mrf.mxu1  ;;  %v653_v11 = vpop.f32.mrf.mxu0 }
 0x3d6   :  { %v1444_v9 = vmul.f32 -1.442695, %v726_v7  ;;  %v733_v12 = vadd.f32 %v1442_v10, %v653_v11  ;;  %v2797_v7 = vld [vmem:[%s3215_s2 + $0xd8] sm:$0xff]  ;;  %v2924_v10 = vld [vmem:[%s3215_s2 + $0xe8] sm:$0xff] }
 0x3d7   :  { %v2906_v8 = vld [vmem:[%s3215_s2 + $0x118] sm:$0xff]  ;;  %v2930_v11 = vld [vmem:[%s3215_s2 + $0xc8] sm:$0xff] }
 0x3d8   :  { %1919 = vpow2.f32 %v1444_v9  ;;  %v1445_v13 = vmul.f32 -1.442695, %v733_v12  ;;  %v2915_v9 = vld [vmem:[%s3215_s2 + $0x100] sm:$0xff] }
 0x3d9   :  { %v2937_v12 = vld [vmem:[%s3215_s2 + $0xc0] sm:$0xff] }
 0x3da   :  { %1921 = vpow2.f32 %v1445_v13  ;;  %v2943_v13 = vld [vmem:[%s3215_s2 + $0xd0] sm:$0xff] }
 0x3e5   :  { %v1920_v15 = vpop.eup %1919 }
 0x3e6   :  { %v730_v49 = vadd.f32 1.0, %v1920_v15  ;;  %v2949_v15 = vld [vmem:[%s3215_s2 + $0xb0] sm:$0xff] }
 0x3e7   :  { %v1922_v57 = vpop.eup %1921 }
 0x3e8   :  { %1923 = vrcp.f32 %v730_v49  ;;  %v737_v61 = vadd.f32 1.0, %v1922_v57  ;;  %v2956_v49 = vld [vmem:[%s3215_s2 + $0xa8] sm:$0xff]  ;;  %v2962_v57 = vld [vmem:[%s3215_s2 + $0xb8] sm:$0xff] }
 0x3f5   :  { %v1924_v58 = vpop.eup %1923 }
 0x3f6   :  { %v741_v54 = vmul.f32 %v1924_v58, %v740_v3  ;;  %v2968_v3 = vld [vmem:[%s3215_s2 + $0x98] sm:$0xff]  ;;  %v2975_v58 = vld [vmem:[%s3215_s2 + $0x90] sm:$0xff] }
 0x3f8   :  { %v742_v55 = vadd.f32 %v1443_v53, %v741_v54  ;;  %v2981_v53 = vld [vmem:[%s3215_s2 + $0xa0] sm:$0xff] }
 0x3f9   :  { %v2987_v54 = vld [vmem:[%s3215_s2 + $0x80] sm:$0xff] }
 0x3fa   :  { %1925 = vtanh.f32 %v742_v55  ;;  %v2994_v55 = vld [vmem:[%s3215_s2 + $0x78] sm:$0xff] }
 0x3fb   :  { %1927 = vrcp.f32 %v737_v61  ;;  %v3000_v61 = vld [vmem:[%s3215_s2 + $0x88] sm:$0xff] }
 0x407   :  { %v1926_v63 = vpop.eup %1925 }
 0x408   :  { %v744_v59 = vsub.f32 %v2616_v52, %v1926_v63  ;;  %v1928_v60 = vpop.eup %1927  ;;  %v2727_v52 = vld [vmem:[%s3215_s2 + $0x150] sm:$0xff] }
 0x40a   :  { %v745_v44 = vmul.f32 %v1928_v60, %v744_v59  ;;  %v3013_v59 = vld [vmem:[%s3215_s2 + $0x60] sm:$0xff]  ;;  %v3019_v60 = vld [vmem:[%s3215_s2 + $0x70] sm:$0xff] }
 0x40c   :  { %v2702_v56 = vadd.f32 %v1926_v63, %v745_v44  ;;  %v3006_v63 = vld [vmem:[%s3215_s2 + $0x68] sm:$0xff]  ;;  %v3025_v44 = vld [vmem:[%s3215_s2 + $0x50] sm:$0xff] }
 0x40e   :  { %1446 = vst [vmem:[%s3219_s4 + $0x18] sm:$0xff] %v2702_v56  ;;  %818 = vmatmul.mubr.f32.vlgmr.msra.gmra.mxu0 %v2702_v56  ;;  %1780 = vmatmul.mubr.f32.vlgmr.msra.gmra.mxu1 %v2702_v56 }
 0x40f   :  { %922 = vmatpush1.msra.mxu0 %v2713_v50  ;;  %1783 = vmatpush3.msra.mxu1 %v2127_v14  ;;  %v2734_v14 = vld [vmem:[%s3215_s2 + $0x140] sm:$0xff] }
 0x410   :  { %923 = vmatprep.subr.mxu0 %v2720_v51  ;;  %1784 = vmatprep.subr.mxu1 %v3229_v0 }
 0x411   :  { %924 = vmatpush1.msra.mxu0 %v2727_v52  ;;  %1785 = vmatpush3.msra.mxu1 %v2139_v16  ;;  %v2748_v16 = vld [vmem:[%s3215_s2 + $0x128] sm:$0xff] }
 0x412   :  { %925 = vmatprep.subr.mxu0 %v2734_v14  ;;  %1786 = vmatprep.subr.mxu1 %v3229_v0 }
 0x413   :  { %926 = vmatpush1.msra.mxu0 %v2741_v2  ;;  %1787 = vmatpush3.msra.mxu1 %v2151_v18  ;;  %v2762_v18 = vld [vmem:[%s3215_s2 + $0x110] sm:$0xff] }
 0x414   :  { %927 = vmatprep.subr.mxu0 %v2748_v16  ;;  %1788 = vmatprep.subr.mxu1 %v3229_v0 }
 0x415   :  { %928 = vmatpush1.msra.mxu0 %v2755_v4  ;;  %1789 = vmatpush3.msra.mxu1 %v2170_v21  ;;  %v2776_v21 = vld [vmem:[%s3215_s2 + $0xf8] sm:$0xff] }
 0x416   :  { %929 = vmatprep.subr.mxu0 %v2762_v18  ;;  %1790 = vmatprep.subr.mxu1 %v3229_v0 }
 0x417   :  { %930 = vmatpush1.msra.mxu0 %v2769_v5  ;;  %1791 = vmatpush3.msra.mxu1 %v2189_v24  ;;  %v2790_v24 = vld [vmem:[%s3215_s2 + $0xe0] sm:$0xff] }
 0x418   :  { %931 = vmatprep.subr.mxu0 %v2776_v21  ;;  %1792 = vmatprep.subr.mxu1 %v3229_v0 }
 0x419   :  { %932 = vmatpush1.msra.mxu0 %v2783_v6  ;;  %1793 = vmatpush3.msra.mxu1 %v2208_v27  ;;  %v1448_v27 = vld [vmem:[%s3217_s0 + $0x68] sm:$0xff] }
 0x41a   :  { %933 = vmatprep.subr.mxu0 %v2790_v24  ;;  %1794 = vmatprep.subr.mxu1 %v3229_v0 }
 0x41b   :  { %934 = vmatpush1.msra.mxu0 %v2797_v7  ;;  %1795 = vmatpush3.msra.mxu1 %v2227_v30 }
 0x41c   :  { %935 = vmatprep.subr.mxu0 %v2145_v17  ;;  %1796 = vmatprep.subr.mxu1 %v3229_v0  ;;  %v2843_v17 = vld [vmem:[%s3215_s2 + $0x170] sm:$0xff] }
 0x41d   :  { %936 = vmatpush1.msra.mxu0 %v2157_v19  ;;  %1797 = vmatpush3.msra.mxu1 %v2246_v33  ;;  %v1447_v19 = vld [vmem:[%s3217_s0 + $0x60] sm:$0xff] }
 0x41e   :  { %937 = vmatprep.subr.mxu0 %v2164_v20  ;;  %1798 = vmatprep.subr.mxu1 %v3229_v0 }
 0x41f   :  { %938 = vmatpush1.msra.mxu0 %v2176_v22  ;;  %1799 = vmatpush3.msra.mxu1 %v2265_v36  ;;  %v1449_v36 = vld [vmem:[%s3217_s0 + $0x70] sm:$0xff] }
 0x420   :  { %939 = vmatprep.subr.mxu0 %v2183_v23  ;;  %1800 = vmatprep.subr.mxu1 %v3229_v0 }
 0x421   :  { %940 = vmatpush1.msra.mxu0 %v2195_v25  ;;  %1801 = vmatpush3.msra.mxu1 %v2284_v39 }
 0x422   :  { %941 = vmatprep.subr.mxu0 %v2202_v26  ;;  %1802 = vmatprep.subr.mxu1 %v3229_v0 }
 0x423   :  { %942 = vmatpush1.msra.mxu0 %v2214_v28  ;;  %1803 = vmatpush3.msra.mxu1 %v2303_v42 }
 0x424   :  { %943 = vmatprep.subr.mxu0 %v2221_v29  ;;  %1804 = vmatprep.subr.mxu1 %v3229_v0 }
 0x425   :  { %944 = vmatpush1.msra.mxu0 %v2233_v31  ;;  %1805 = vmatpush3.msra.mxu1 %v2322_v45 }
 0x426   :  { %945 = vmatprep.subr.mxu0 %v2240_v32  ;;  %1806 = vmatprep.subr.mxu1 %v3229_v0 }
 0x427   :  { %946 = vmatpush1.msra.mxu0 %v2252_v34  ;;  %1807 = vmatpush3.msra.mxu1 %v2331_v46  ;;  %v2870_v46 = vld [vmem:[%s3215_s2 + $0x178] sm:$0xff] }
 0x428   :  { %947 = vmatprep.subr.mxu0 %v2259_v35  ;;  %1808 = vmatprep.subr.mxu1 %v3229_v0 }
 0x429   :  { %948 = vmatpush1.msra.mxu0 %v2271_v37  ;;  %1809 = vmatpush3.msra.mxu1 %v2339_v47  ;;  %v2879_v47 = vld [vmem:[%s3215_s2 + $0x160] sm:$0xff] }
 0x42a   :  { %949 = vmatprep.subr.mxu0 %v2278_v38  ;;  %1810 = vmatprep.subr.mxu1 %v3229_v0 }
 0x42b   :  { %950 = vmatpush1.msra.mxu0 %v2290_v40  ;;  %1811 = vmatpush3.msra.mxu1 %v2348_v48  ;;  %v2888_v48 = vld [vmem:[%s3215_s2 + $0x148] sm:$0xff] }
 0x42c   :  { %951 = vmatprep.subr.mxu0 %v2297_v41  ;;  %1812 = vmatprep.subr.mxu1 %v3229_v0 }
 0x42d   :  { %952 = vmatpush1.msra.mxu0 %v2309_v43  ;;  %985 = vmatprep.mubr.f32.mxu0 %v3229_v0 }
 0x42e   :  { %1813 = vmatpush3.msra.mxu1 %v3231_v1  ;;  %1814 = vmatprep.mubr.msk.f32.mxu1 %vm2019_vm0, %v3229_v0  ;;  %v2897_v1 = vld [vmem:[%s3215_s2 + $0x130] sm:$0xff] }
 0x42f   :  { %1089 = vmatprep.subr.mxu0 %v2843_v17  ;;  %1817 = vmatprep.subr.mxu1 %v3229_v0 }
 0x4ce   :  { %v819_v20 = vpop.f32.mrf.mxu0  ;;  %v890_v22 = vpop.f32.mrf.mxu1 }
 0x4cf   :  { %v894_v23 = vadd.f32 %v1447_v19, %v819_v20  ;;  %v908_v34 = vadd.f32 %v2437_v62, %v890_v22  ;;  %v3038_v19 = vld [vmem:[%s3215_s2 + $0x58] sm:$0xff]  ;;  %v3051_v22 = vld [vmem:[%s3215_s2 + $0x30] sm:$0xff] }
 0x4d0   :  { %v1781_v25 = vpop.f32.mrf.mxu1  ;;  %v821_v28 = vpop.f32.mrf.mxu0  ;;  %v3044_v20 = vld [vmem:[%s3215_s2 + $0x38] sm:$0xff] }
 0x4d1   :  { %v1450_v26 = vmul.f32 -1.442695, %v894_v23  ;;  %v901_v29 = vadd.f32 %v1448_v27, %v821_v28  ;;  %v3057_v23 = vld [vmem:[%s3215_s2 + $0x40] sm:$0xff]  ;;  %v3076_v27 = vld [vmem:[%s3215_s2 + $0x28] sm:$0xff] }
 0x4d2   :  { %v3063_v25 = vld [vmem:[%s3215_s2 + $0x20] sm:$0xff]  ;;  %v3082_v28 = vld [vmem:[%s3215_s2 + $0x8] sm:$0xff] }
 0x4d3   :  { %1929 = vpow2.f32 %v1450_v26  ;;  %v1451_v30 = vmul.f32 -1.442695, %v901_v29  ;;  %v3070_v26 = vld [vmem:[%s3215_s2 + $0x18] sm:$0xff]  ;;  %v3089_v29 = vld [vmem:[%s3215_s2] sm:$0xff] }
 0x4d5   :  { %1931 = vpow2.f32 %v1451_v30  ;;  %v3096_v30 = vld [vmem:[%s3215_s2 + $0x10] sm:$0xff] }
 0x4d6   :  { %3233 = vst [vmem:[#allocation4_spill] sm:$0xff] %v3096_v30 }
 0x4e0   :  { %v1930_v31 = vpop.eup %1929 }
 0x4e1   :  { %v898_v32 = vadd.f32 1.0, %v1930_v31  ;;  %v1453_v31 = vld [vmem:[%s3217_s0 + $0x78] sm:$0xff] }
 0x4e2   :  { %v1932_v33 = vpop.eup %1931 }
 0x4e3   :  { %1933 = vrcp.f32 %v898_v32  ;;  %v905_v39 = vadd.f32 1.0, %v1932_v33 }
 0x4f0   :  { %v1934_v35 = vpop.eup %1933 }
 0x4f1   :  { %v909_v37 = vmul.f32 %v1934_v35, %v908_v34 }
 0x4f3   :  { %v910_v38 = vadd.f32 %v1449_v36, %v909_v37  ;;  %v1454_v37 = vld [vmem:[%s3217_s0 + $0x80] sm:$0xff] }
 0x4f5   :  { %1935 = vtanh.f32 %v910_v38 }
 0x4f6   :  { %1937 = vrcp.f32 %v905_v39 }
 0x502   :  { %v1936_v40 = vpop.eup %1935 }
 0x503   :  { %v912_v41 = vsub.f32 %v2702_v56, %v1936_v40  ;;  %v1938_v42 = vpop.eup %1937  ;;  %v3032_v56 = vld [vmem:[%s3215_s2 + $0x48] sm:$0xff] }
 0x505   :  { %v913_v43 = vmul.f32 %v1938_v42, %v912_v41 }
 0x507   :  { %v2858_v45 = vadd.f32 %v1936_v40, %v913_v43 }
 0x509   :  { %1452 = vst [vmem:[%s3219_s4 + $0x20] sm:$0xff] %v2858_v45  ;;  %986 = vmatmul.mubr.f32.vlgmr.msra.gmra.mxu0 %v2858_v45  ;;  %1815 = vmatmul.mubr.f32.vlgmr.msra.gmra.mxu1 %v2858_v45 }
 0x50a   :  { %1090 = vmatpush1.msra.mxu0 %v2713_v50  ;;  %1818 = vmatpush3.msra.mxu1 %v2870_v46 }
 0x50b   :  { %1091 = vmatprep.subr.mxu0 %v2720_v51  ;;  %1819 = vmatprep.subr.mxu1 %v3229_v0 }
 0x50c   :  { %1092 = vmatpush1.msra.mxu0 %v2727_v52  ;;  %1820 = vmatpush3.msra.mxu1 %v2879_v47 }
 0x50d   :  { %1093 = vmatprep.subr.mxu0 %v2734_v14  ;;  %1821 = vmatprep.subr.mxu1 %v3229_v0 }
 0x50e   :  { %1094 = vmatpush1.msra.mxu0 %v2741_v2  ;;  %1822 = vmatpush3.msra.mxu1 %v2888_v48 }
 0x50f   :  { %1095 = vmatprep.subr.mxu0 %v2748_v16  ;;  %1823 = vmatprep.subr.mxu1 %v3229_v0 }
 0x510   :  { %1096 = vmatpush1.msra.mxu0 %v2755_v4  ;;  %1824 = vmatpush3.msra.mxu1 %v2897_v1 }
 0x511   :  { %1097 = vmatprep.subr.mxu0 %v2762_v18  ;;  %1825 = vmatprep.subr.mxu1 %v3229_v0 }
 0x512   :  { %1098 = vmatpush1.msra.mxu0 %v2769_v5  ;;  %1826 = vmatpush3.msra.mxu1 %v2906_v8 }
 0x513   :  { %1099 = vmatprep.subr.mxu0 %v2776_v21  ;;  %1827 = vmatprep.subr.mxu1 %v3229_v0 }
 0x514   :  { %1100 = vmatpush1.msra.mxu0 %v2783_v6  ;;  %1828 = vmatpush3.msra.mxu1 %v2915_v9 }
 0x515   :  { %1101 = vmatprep.subr.mxu0 %v2790_v24  ;;  %1829 = vmatprep.subr.mxu1 %v3229_v0 }
 0x516   :  { %1102 = vmatpush1.msra.mxu0 %v2797_v7  ;;  %1830 = vmatpush3.msra.mxu1 %v2924_v10 }
 0x517   :  { %1103 = vmatprep.subr.mxu0 %v2930_v11  ;;  %1831 = vmatprep.subr.mxu1 %v3229_v0 }
 0x518   :  { %1104 = vmatpush1.msra.mxu0 %v2937_v12  ;;  %1832 = vmatpush3.msra.mxu1 %v2943_v13 }
 0x519   :  { %1105 = vmatprep.subr.mxu0 %v2949_v15  ;;  %1833 = vmatprep.subr.mxu1 %v3229_v0 }
 0x51a   :  { %1106 = vmatpush1.msra.mxu0 %v2956_v49  ;;  %1834 = vmatpush3.msra.mxu1 %v2962_v57 }
 0x51b   :  { %1107 = vmatprep.subr.mxu0 %v2968_v3  ;;  %1835 = vmatprep.subr.mxu1 %v3229_v0 }
 0x51c   :  { %1108 = vmatpush1.msra.mxu0 %v2975_v58  ;;  %1836 = vmatpush3.msra.mxu1 %v2981_v53 }
 0x51d   :  { %1109 = vmatprep.subr.mxu0 %v2987_v54  ;;  %1837 = vmatprep.subr.mxu1 %v3229_v0 }
 0x51e   :  { %1110 = vmatpush1.msra.mxu0 %v2994_v55  ;;  %1838 = vmatpush3.msra.mxu1 %v3000_v61 }
 0x51f   :  { %1111 = vmatprep.subr.mxu0 %v3006_v63  ;;  %1839 = vmatprep.subr.mxu1 %v3229_v0 }
 0x520   :  { %1112 = vmatpush1.msra.mxu0 %v3013_v59  ;;  %1840 = vmatpush3.msra.mxu1 %v3019_v60 }
 0x521   :  { %1113 = vmatprep.subr.mxu0 %v3025_v44  ;;  %1841 = vmatprep.subr.mxu1 %v3229_v0 }
 0x522   :  { %1114 = vmatpush1.msra.mxu0 %v3032_v56  ;;  %1842 = vmatpush3.msra.mxu1 %v3038_v19 }
 0x523   :  { %1115 = vmatprep.subr.mxu0 %v3044_v20  ;;  %1843 = vmatprep.subr.mxu1 %v3229_v0 }
 0x524   :  { %1116 = vmatpush1.msra.mxu0 %v3051_v22  ;;  %1844 = vmatpush3.msra.mxu1 %v3057_v23 }
 0x525   :  { %1117 = vmatprep.subr.mxu0 %v3063_v25  ;;  %1845 = vmatprep.subr.mxu1 %v3229_v0 }
 0x526   :  { %1118 = vmatpush1.msra.mxu0 %v3070_v26  ;;  %1846 = vmatpush3.msra.mxu1 %v3076_v27 }
 0x527   :  { %1119 = vmatprep.subr.mxu0 %v3082_v28  ;;  %1847 = vmatprep.subr.mxu1 %v3229_v0 }
 0x528   :  { %1120 = vmatpush1.msra.mxu0 %v3089_v29  ;;  %1153 = vmatprep.mubr.f32.mxu0 %v3229_v0 }
 0x529   :  { %1848 = vmatpush3.msra.mxu1 %v3096_v30  ;;  %1849 = vmatprep.mubr.msk.f32.mxu1 %vm2019_vm0, %v3229_v0 }
 0x52a   :  { %1257 = vmatprep.subr.mxu0 %v2843_v17  ;;  %1852 = vmatprep.subr.mxu1 %v3229_v0 }
 0x5c9   :  { %v987_v32 = vpop.f32.mrf.mxu0  ;;  %v1058_v33 = vpop.f32.mrf.mxu1 }
 0x5ca   :  { %v1062_v34 = vadd.f32 %v1453_v31, %v987_v32  ;;  %v1076_v43 = vadd.f32 %v2437_v62, %v1058_v33  ;;  %v1455_v31 = vld [vmem:[%s3217_s0 + $0x88] sm:$0xff] }
 0x5cb   :  { %v1816_v35 = vpop.f32.mrf.mxu1  ;;  %v989_v38 = vpop.f32.mrf.mxu0  ;;  %v3234_v62 = vld [vmem:[#allocation4_spill] sm:$0xff] }
 0x5cc   :  { %v1456_v36 = vmul.f32 -1.442695, %v1062_v34  ;;  %v1069_v39 = vadd.f32 %v1454_v37, %v989_v38 }
 0x5ce   :  { %1939 = vpow2.f32 %v1456_v36  ;;  %v1457_v40 = vmul.f32 -1.442695, %v1069_v39 }
 0x5d0   :  { %1941 = vpow2.f32 %v1457_v40 }
 0x5db   :  { %v1940_v17 = vpop.eup %1939 }
 0x5dc   :  { %v1066_v41 = vadd.f32 1.0, %v1940_v17 }
 0x5dd   :  { %v1942_v42 = vpop.eup %1941 }
 0x5de   :  { %1943 = vrcp.f32 %v1066_v41  ;;  %v1073_v35 = vadd.f32 1.0, %v1942_v42 }
 0x5eb   :  { %v1944_v30 = vpop.eup %1943 }
 0x5ec   :  { %v1077_v32 = vmul.f32 %v1944_v30, %v1076_v43 }
 0x5ee   :  { %v1078_v34 = vadd.f32 %v1455_v31, %v1077_v32 }
 0x5f0   :  { %1945 = vtanh.f32 %v1078_v34 }
 0x5f1   :  { %1947 = vrcp.f32 %v1073_v35 }
 0x5fd   :  { %v1946_v36 = vpop.eup %1945 }
 0x5fe   :  { %v1080_v37 = vsub.f32 %v2858_v45, %v1946_v36  ;;  %v1948_v38 = vpop.eup %1947 }
 0x600   :  { %v1081_v39 = vmul.f32 %v1948_v38, %v1080_v37 }
 0x602   :  { %v3114_v40 = vadd.f32 %v1946_v36, %v1081_v39 }
 0x604   :  { %1458 = vst [vmem:[%s3219_s4 + $0x28] sm:$0xff] %v3114_v40  ;;  %1154 = vmatmul.mubr.f32.vlgmr.msra.gmra.mxu0 %v3114_v40  ;;  %1850 = vmatmul.mubr.f32.vlgmr.msra.gmra.mxu1 %v3114_v40 }
 0x605   :  { %1258 = vmatpush1.msra.mxu0 %v2713_v50  ;;  %1853 = vmatpush3.msra.mxu1 %v2870_v46  ;;  %v1459_v50 = vld [vmem:[%s3217_s0 + $0x90] sm:$0xff] }
 0x606   :  { %1259 = vmatprep.subr.mxu0 %v2720_v51  ;;  %1854 = vmatprep.subr.mxu1 %v3229_v0 }
 0x607   :  { %1260 = vmatpush1.msra.mxu0 %v2727_v52  ;;  %1855 = vmatpush3.msra.mxu1 %v2879_v47  ;;  %v1461_v47 = vld [vmem:[%s3217_s0 + $0xa0] sm:$0xff] }
 0x608   :  { %1261 = vmatprep.subr.mxu0 %v2734_v14  ;;  %1856 = vmatprep.subr.mxu1 %v3229_v0 }
 0x609   :  { %1262 = vmatpush1.msra.mxu0 %v2741_v2  ;;  %1857 = vmatpush3.msra.mxu1 %v2888_v48 }
 0x60a   :  { %1263 = vmatprep.subr.mxu0 %v2748_v16  ;;  %1858 = vmatprep.subr.mxu1 %v3229_v0 }
 0x60b   :  { %1264 = vmatpush1.msra.mxu0 %v2755_v4  ;;  %1859 = vmatpush3.msra.mxu1 %v2897_v1  ;;  %v1460_v4 = vld [vmem:[%s3217_s0 + $0x98] sm:$0xff] }
 0x60c   :  { %1265 = vmatprep.subr.mxu0 %v2762_v18  ;;  %1860 = vmatprep.subr.mxu1 %v3229_v0 }
 0x60d   :  { %1266 = vmatpush1.msra.mxu0 %v2769_v5  ;;  %1861 = vmatpush3.msra.mxu1 %v2906_v8 }
 0x60e   :  { %1267 = vmatprep.subr.mxu0 %v2776_v21  ;;  %1862 = vmatprep.subr.mxu1 %v3229_v0 }
 0x60f   :  { %1268 = vmatpush1.msra.mxu0 %v2783_v6  ;;  %1863 = vmatpush3.msra.mxu1 %v2915_v9 }
 0x610   :  { %1269 = vmatprep.subr.mxu0 %v2790_v24  ;;  %1864 = vmatprep.subr.mxu1 %v3229_v0 }
 0x611   :  { %1270 = vmatpush1.msra.mxu0 %v2797_v7  ;;  %1865 = vmatpush3.msra.mxu1 %v2924_v10  ;;  %v2017_v7 = vld [vmem:[%s3218_s3] ss:$0 sm:$0xff] }
 0x612   :  { %1271 = vmatprep.subr.mxu0 %v2930_v11  ;;  %1866 = vmatprep.subr.mxu1 %v3229_v0 }
 0x613   :  { %1272 = vmatpush1.msra.mxu0 %v2937_v12  ;;  %1867 = vmatpush3.msra.mxu1 %v2943_v13 }
 0x614   :  { %1273 = vmatprep.subr.mxu0 %v2949_v15  ;;  %1868 = vmatprep.subr.mxu1 %v3229_v0  ;;  %v1465_v15 = vld [vmem:[%s3217_s0 + $0xa8] sm:$0xff] }
 0x615   :  { %1274 = vmatpush1.msra.mxu0 %v2956_v49  ;;  %1869 = vmatpush3.msra.mxu1 %v2962_v57 }
 0x616   :  { %1275 = vmatprep.subr.mxu0 %v2968_v3  ;;  %1870 = vmatprep.subr.mxu1 %v3229_v0 }
 0x617   :  { %1276 = vmatpush1.msra.mxu0 %v2975_v58  ;;  %1871 = vmatpush3.msra.mxu1 %v2981_v53 }
 0x618   :  { %1277 = vmatprep.subr.mxu0 %v2987_v54  ;;  %1872 = vmatprep.subr.mxu1 %v3229_v0  ;;  %v1466_v54 = vld [vmem:[%s3217_s0 + $0xb0] sm:$0xff] }
 0x619   :  { %1278 = vmatpush1.msra.mxu0 %v2994_v55  ;;  %1873 = vmatpush3.msra.mxu1 %v3000_v61 }
 0x61a   :  { %1279 = vmatprep.subr.mxu0 %v3006_v63  ;;  %1874 = vmatprep.subr.mxu1 %v3229_v0 }
 0x61b   :  { %1280 = vmatpush1.msra.mxu0 %v3013_v59  ;;  %1875 = vmatpush3.msra.mxu1 %v3019_v60 }
 0x61c   :  { %1281 = vmatprep.subr.mxu0 %v3025_v44  ;;  %1876 = vmatprep.subr.mxu1 %v3229_v0 }
 0x61d   :  { %1282 = vmatpush1.msra.mxu0 %v3032_v56  ;;  %1877 = vmatpush3.msra.mxu1 %v3038_v19 }
 0x61e   :  { %1283 = vmatprep.subr.mxu0 %v3044_v20  ;;  %1878 = vmatprep.subr.mxu1 %v3229_v0  ;;  %v1467_v20 = vld [vmem:[%s3217_s0 + $0xb8] sm:$0xff] }
 0x61f   :  { %1284 = vmatpush1.msra.mxu0 %v3051_v22  ;;  %1879 = vmatpush3.msra.mxu1 %v3057_v23 }
 0x620   :  { %1285 = vmatprep.subr.mxu0 %v3063_v25  ;;  %1880 = vmatprep.subr.mxu1 %v3229_v0 }
 0x621   :  { %1286 = vmatpush1.msra.mxu0 %v3070_v26  ;;  %1881 = vmatpush3.msra.mxu1 %v3076_v27 }
 0x622   :  { %1287 = vmatprep.subr.mxu0 %v3082_v28  ;;  %1882 = vmatprep.subr.mxu1 %v3229_v0 }
 0x623   :  { %1288 = vmatpush1.msra.mxu0 %v3089_v29  ;;  %1321 = vmatprep.mubr.f32.mxu0 %v3229_v0 }
 0x624   :  { %1883 = vmatpush3.msra.mxu1 %v3234_v62  ;;  %1884 = vmatprep.mubr.msk.f32.mxu1 %vm2019_vm0, %v3229_v0 }
 0x6c4   :  { %v1155_v51 = vpop.f32.mrf.mxu0  ;;  %v1226_v52 = vpop.f32.mrf.mxu1 }
 0x6c5   :  { %v1230_v14 = vadd.f32 %v1459_v50, %v1155_v51  ;;  %v1244_v45 = vadd.f32 %v2017_v7, %v1226_v52 }
 0x6c6   :  { %v1851_v2 = vpop.f32.mrf.mxu1  ;;  %v1157_v18 = vpop.f32.mrf.mxu0 }
 0x6c7   :  { %v1462_v16 = vmul.f32 -1.442695, %v1230_v14  ;;  %v1237_v5 = vadd.f32 %v1460_v4, %v1157_v18 }
 0x6c9   :  { %1949 = vpow2.f32 %v1462_v16  ;;  %v1463_v21 = vmul.f32 -1.442695, %v1237_v5 }
 0x6cb   :  { %1951 = vpow2.f32 %v1463_v21 }
 0x6d6   :  { %v1950_v6 = vpop.eup %1949 }
 0x6d7   :  { %v1234_v24 = vadd.f32 1.0, %v1950_v6 }
 0x6d8   :  { %v1952_v0 = vpop.eup %1951 }
 0x6d9   :  { %1953 = vrcp.f32 %v1234_v24  ;;  %v1241_v8 = vadd.f32 1.0, %v1952_v0 }
 0x6e6   :  { %v1954_v46 = vpop.eup %1953 }
 0x6e7   :  { %v1245_v48 = vmul.f32 %v1954_v46, %v1244_v45 }
 0x6e9   :  { %v1246_v1 = vadd.f32 %v1461_v47, %v1245_v48 }
 0x6eb   :  { %1955 = vtanh.f32 %v1246_v1 }
 0x6ec   :  { %1957 = vrcp.f32 %v1241_v8 }
 0x6f8   :  { %v1956_v9 = vpop.eup %1955 }
 0x6f9   :  { %v1248_v10 = vsub.f32 %v3114_v40, %v1956_v9  ;;  %v1958_v11 = vpop.eup %1957 }
 0x6fb   :  { %v1249_v12 = vmul.f32 %v1958_v11, %v1248_v10 }
 0x6fd   :  { %v1250_v13 = vadd.f32 %v1956_v9, %v1249_v12 }
 0x6ff   :  { %1464 = vst [vmem:[%s3219_s4 + $0x30] sm:$0xff] %v1250_v13  ;;  %1322 = vmatmul.mubr.f32.vlgmr.msra.gmra.mxu0 %v1250_v13  ;;  %1885 = vmatmul.mubr.f32.vlgmr.msra.gmra.mxu1 %v1250_v13 }
 0x7bf   :  { %v1323_v49 = vpop.f32.mrf.mxu0  ;;  %v1394_v57 = vpop.f32.mrf.mxu1 }
 0x7c0   :  { %v1398_v3 = vadd.f32 %v1465_v15, %v1323_v49  ;;  %v1412_v56 = vadd.f32 %v2017_v7, %v1394_v57 }
 0x7c1   :  { %v1886_v58 = vpop.f32.mrf.mxu1  ;;  %v1325_v55 = vpop.f32.mrf.mxu0 }
 0x7c2   :  { %v1468_v53 = vmul.f32 -1.442695, %v1398_v3  ;;  %v1405_v61 = vadd.f32 %v1466_v54, %v1325_v55 }
 0x7c4   :  { %1959 = vpow2.f32 %v1468_v53  ;;  %v1469_v63 = vmul.f32 -1.442695, %v1405_v61 }
 0x7c6   :  { %1961 = vpow2.f32 %v1469_v63 }
 0x7d1   :  { %v1960_v59 = vpop.eup %1959 }
 0x7d2   :  { %v1402_v60 = vadd.f32 1.0, %v1960_v59 }
 0x7d3   :  { %v1962_v44 = vpop.eup %1961 }
 0x7d4   :  { %1963 = vrcp.f32 %v1402_v60  ;;  %v1409_v25 = vadd.f32 1.0, %v1962_v44 }
 0x7e1   :  { %v1964_v19 = vpop.eup %1963 }
 0x7e2   :  { %v1413_v22 = vmul.f32 %v1964_v19, %v1412_v56 }
 0x7e4   :  { %v1414_v23 = vadd.f32 %v1467_v20, %v1413_v22 }
 0x7e6   :  { %1965 = vtanh.f32 %v1414_v23 }
 0x7e7   :  { %1967 = vrcp.f32 %v1409_v25 }
 0x7f3   :  { %v1966_v26 = vpop.eup %1965 }
 0x7f4   :  { %v1416_v27 = vsub.f32 %v1250_v13, %v1966_v26  ;;  %v1968_v28 = vpop.eup %1967 }
 0x7f6   :  { %v1417_v29 = vmul.f32 %v1968_v28, %v1416_v27 }
 0x7f8   :  { %v1418_v30 = vadd.f32 %v1966_v26, %v1417_v29 }
 0x7fa   :  { %1470 = vst [vmem:[%s3219_s4 + $0x38] sm:$0xff] %v1418_v30 }

</bundles_post_ra>
